<compile_context>
chip_gen: v7x
topology: tpu7x:2x2x1
jax: 0.10.0
libtpu: 0.0.40
codegen_flags: <defaults>
</compile_context>

<pallas_src>
import jax
import jax.numpy as jnp
from jax.experimental import pallas as pl
from jax.experimental.pallas import tpu as pltpu


def _round_up(x, m):
    return ((x + m - 1) // m) * m


def _edge_tile_index(n, e, first_tile, num_tiles):
    # Clamp so padding steps (e >= num_tiles[n]) re-point at the last valid tile
    # (no OOB DMA); their compute is skipped in the kernel via pl.when.
    return first_tile[n] + jnp.minimum(e, jnp.maximum(num_tiles[n] - 1, 0))


def gnn_layer_kernel(first_tile_ref, num_tiles_ref,          # scalar-prefetch (SMEM)
                     feat_ref, obj_ref, wf_ref, ba_ref, wa_ref, wh_ref,
                     out_ref, acc_ref):
    """One (node_tile, edge_tile_within_node_tile) grid step."""
    n = pl.program_id(0)
    e = pl.program_id(1)

    @pl.when(e == 0)
    def _():
        acc_ref[...] = jnp.zeros_like(acc_ref)

    @pl.when(e < num_tiles_ref[n])
    def _():
        feat = feat_ref[...]                            # [tile_e, 3*in_dim]  bf16
        in_dim = feat.shape[1] // 3

        # Fused attention MLP: one MXU pass over [hs|hr|hqr] @ [Ws; Wr; Wqr] + bias.
        attn = jnp.dot(feat, wf_ref[...], preferred_element_type=jnp.float32)
        attn = jnp.maximum(attn + ba_ref[...], 0.0)     # [tile_e, attn_pad] f32
        # NB: lane `attn_dim` of ba is 1.0 with a zero weight column, so that lane of
        # `attn` is constantly 1 and carries the w_alpha bias through `wa` below.

        # alpha = sigmoid(w_alpha . attn + b): VPU multiply + lane reduction
        # (avoids an MXU matmul with output width 1).
        logits = jnp.sum(attn * wa_ref[...], axis=-1, keepdims=True)
        alpha = jax.nn.sigmoid(logits)                  # [tile_e, 1] f32

        # Only hs and hr are needed downstream -> cast just 2/3 of feat to f32 (v5e VPU).
        hs_hr = feat[:, : 2 * in_dim].astype(jnp.float32)
        message = alpha * (hs_hr[:, :in_dim] + hs_hr[:, in_dim:])
        message_bf = message.astype(jnp.bfloat16)       # [tile_e, in_dim]

        # Scatter-sum over destination node: one-hot built pre-transposed as
        # [tile_n, tile_e] (MXU-natural contraction axes), bf16 inputs, f32 accumulate.
        tile_n = acc_ref.shape[0]
        obj_local = obj_ref[...] - n * tile_n           # [1, tile_e] int32
        node_iota = jax.lax.broadcasted_iota(jnp.int32, (tile_n, obj_local.shape[1]), 0)
        onehot = (node_iota == obj_local).astype(jnp.bfloat16)   # [tile_n, tile_e]
        acc_ref[...] += jnp.dot(onehot, message_bf,
                                preferred_element_type=jnp.float32)

    # Finalize: hidden_new = act(W_h(message_agg)); act = identity (module default).
    @pl.when(e == pl.num_programs(1) - 1)
    def _():
        out_ref[...] = jnp.dot(acc_ref[...], wh_ref[...],
                               preferred_element_type=jnp.float32)


def gnn_layer_forward(q_sub, q_rel, hidden, edges, n_node, old_nodes_new_idx, params,
                      *, tile_e=1024, tile_n=256):
    """Mirrors GNNLayer.forward (q_sub / old_nodes_new_idx unused, as in PyTorch)."""
    del q_sub, old_nodes_new_idx

    sub = edges[:, 4].astype(jnp.int32)
    rel = edges[:, 2].astype(jnp.int32)
    obj = edges[:, 5].astype(jnp.int32)
    r_idx = edges[:, 0].astype(jnp.int32)

    E = int(edges.shape[0])
    in_dim = int(hidden.shape[1])
    attn_dim = int(params["Ws_attn"].shape[0])
    out_dim = int(params["W_h"].shape[0])
    three_in = 3 * in_dim

    lane = 128
    attn_p = _round_up(attn_dim + 1, lane)   # +1 spare lane carries the w_alpha bias
    out_p = _round_up(out_dim, lane)

    # --- tile sizing -------------------------------------------------------------
    tile_n = max(8, min(tile_n, _round_up(n_node, 8)))
    if n_node > 8 and _round_up(n_node, tile_n) // tile_n < 2:
        # keep >= 2 node tiles so both v7x TensorCores get a share of the parallel axis
        tile_n = max(8, _round_up((n_node + 1) // 2, 8))
    n_pad = _round_up(n_node, tile_n)
    n_n_tiles = n_pad // tile_n

    tile_e = _round_up(max(128, min(tile_e, _round_up(E, 128))), 128)
    e_pad = _round_up(E, tile_e)

    # --- sort edges by destination node & gather per-edge features (bf16 tables) ---
    order = jnp.argsort(obj)
    obj_s = obj[order]
    sub_s = sub[order]
    rel_s = rel[order]
    r_idx_s = r_idx[order]

    hidden_bf = hidden.astype(jnp.bfloat16)
    rela_bf = params["rela_embed"].astype(jnp.bfloat16)
    hs = hidden_bf[sub_s]                              # [E, in_dim]  bf16
    hr = rela_bf[rel_s]                                # [E, in_dim]  bf16
    h_qr = rela_bf[q_rel][r_idx_s]                     # [E, in_dim]  bf16

    feat = jnp.concatenate([hs, hr, h_qr], axis=1)     # [E, 3*in_dim] bf16
    feat = jnp.pad(feat, ((0, e_pad - E), (0, 0)))
    # Destination ids, lane-dense; padded edges get n_pad => never match any node row.
    obj_row = jnp.pad(obj_s, (0, e_pad - E), constant_values=n_pad).reshape(1, e_pad)

    # --- per-node-tile edge-tile ranges (scalar prefetch, P2 group-offset pattern) --
    bounds = jnp.searchsorted(
        obj_s, jnp.arange(n_n_tiles + 1, dtype=jnp.int32) * tile_n)
    start_e, end_e = bounds[:-1], bounds[1:]
    has_edges = end_e > start_e
    first_tile = jnp.where(has_edges, start_e // tile_e, 0).astype(jnp.int32)
    num_tiles = jnp.where(has_edges,
                          (end_e - 1) // tile_e - start_e // tile_e + 1,
                          0).astype(jnp.int32)
    # Grid extent must be static: concretize here (host sync; wrapper is eager).
    max_tiles = max(int(jnp.max(num_tiles)), 1)

    # --- weights (nn.Linear stores [out, in]; the kernel consumes [in, out]) --------
    wf = jnp.concatenate([params["Ws_attn"].T, params["Wr_attn"].T,
                          params["Wqr_attn"].T], axis=0)                  # [3*in, attn]
    wf = jnp.pad(wf, ((0, 0), (0, attn_p - attn_dim))).astype(jnp.bfloat16)
    ba = (jnp.zeros((1, attn_p), jnp.float32)
          .at[0, :attn_dim].set(params["Wqr_attn_b"].astype(jnp.float32))
          .at[0, attn_dim].set(1.0))                   # spare lane pre-activation = 1
    wa = (jnp.zeros((1, attn_p), jnp.float32)
          .at[0, :attn_dim].set(params["w_alpha"][0].astype(jnp.float32))
          .at[0, attn_dim].set(params["w_alpha_b"][0].astype(jnp.float32)))
    wh = jnp.pad(params["W_h"].T.astype(jnp.float32),
                 ((0, 0), (0, out_p - out_dim)))       # [in_dim, out_p]

    out = pl.pallas_call(
        gnn_layer_kernel,
        out_shape=jax.ShapeDtypeStruct((n_pad, out_p), jnp.float32),
        grid_spec=pltpu.PrefetchScalarGridSpec(
            num_scalar_prefetch=2,
            grid=(n_n_tiles, max_tiles),
            in_specs=[
                # per-edge fused features: only tiles owned by the current node tile
                pl.BlockSpec((tile_e, three_in),
                             lambda n, e, ft, nt: (_edge_tile_index(n, e, ft, nt), 0)),
                # destination node ids, lane-dense [1, tile_e]
                pl.BlockSpec((1, tile_e),
                             lambda n, e, ft, nt: (0, _edge_tile_index(n, e, ft, nt))),
                # weights: single resident blocks
                pl.BlockSpec((three_in, attn_p), lambda n, e, ft, nt: (0, 0)),
                pl.BlockSpec((1, attn_p), lambda n, e, ft, nt: (0, 0)),
                pl.BlockSpec((1, attn_p), lambda n, e, ft, nt: (0, 0)),
                pl.BlockSpec((in_dim, out_p), lambda n, e, ft, nt: (0, 0)),
            ],
            out_specs=pl.BlockSpec((tile_n, out_p), lambda n, e, ft, nt: (n, 0)),
            scratch_shapes=[pltpu.VMEM((tile_n, in_dim), jnp.float32)],
        ),
        compiler_params=pltpu.CompilerParams(
            dimension_semantics=("parallel", "arbitrary"),
            vmem_limit_bytes=32 * 1024 * 1024,
        ),
    )(first_tile, num_tiles, feat, obj_row, wf, ba, wa, wh)

    return out[:n_node, :out_dim]


def _reference(q_rel, hidden, edges, n_node, params):
    sub, rel, obj, r_idx = edges[:, 4], edges[:, 2], edges[:, 5], edges[:, 0]
    hs = hidden[sub]
    hr = params["rela_embed"][rel]
    h_qr = params["rela_embed"][q_rel][r_idx]
    message = hs + hr
    a = (hs @ params["Ws_attn"].T + hr @ params["Wr_attn"].T
         + h_qr @ params["Wqr_attn"].T + params["Wqr_attn_b"])
    a = jnp.maximum(a, 0.0)
    alpha = jax.nn.sigmoid(a @ params["w_alpha"].T + params["w_alpha_b"])
    message = alpha * message
    agg = jax.ops.segment_sum(message, obj, num_segments=n_node)
    return agg @ params["W_h"].T


if __name__ == "__main__":
    # small, deterministic shapes (exercise padding + multi-tile on both grid axes)
    in_dim, out_dim, attn_dim, n_rel = 32, 32, 16, 5
    n_node = 100      # destination nodes
    n_prev = 80       # nodes `hidden` indexes into
    E = 1000          # edges
    B = 3             # number of queries

    key = jax.random.PRNGKey(0)
    ks = jax.random.split(key, 16)

    params = {
        "rela_embed": 0.1 * jax.random.normal(ks[0], (2 * n_rel + 1, in_dim), jnp.float32),
        "Ws_attn":    0.1 * jax.random.normal(ks[1], (attn_dim, in_dim), jnp.float32),
        "Wr_attn":    0.1 * jax.random.normal(ks[2], (attn_dim, in_dim), jnp.float32),
        "Wqr_attn":   0.1 * jax.random.normal(ks[3], (attn_dim, in_dim), jnp.float32),
        "Wqr_attn_b": 0.1 * jax.random.normal(ks[4], (attn_dim,), jnp.float32),
        "w_alpha":    0.1 * jax.random.normal(ks[5], (1, attn_dim), jnp.float32),
        "w_alpha_b":  0.1 * jax.random.normal(ks[6], (1,), jnp.float32),
        "W_h":        0.1 * jax.random.normal(ks[7], (out_dim, in_dim), jnp.float32),
    }

    hidden = jax.random.normal(ks[8], (n_prev, in_dim), jnp.float32)
    q_sub = jax.random.randint(ks[9], (B,), 0, n_prev, jnp.int32)
    q_rel = jax.random.randint(ks[10], (B,), 0, 2 * n_rel + 1, jnp.int32)

    # edges: [E, 6]; columns 0=r_idx (query idx), 2=rel, 4=sub, 5=obj (1, 3 unused)
    r_idx = jax.random.randint(ks[11], (E,), 0, B, jnp.int32)
    rel = jax.random.randint(ks[12], (E,), 0, 2 * n_rel + 1, jnp.int32)
    sub = jax.random.randint(ks[13], (E,), 0, n_prev, jnp.int32)
    obj = jax.random.randint(ks[14], (E,), 0, n_node, jnp.int32)
    zeros = jnp.zeros((E,), jnp.int32)
    edges = jnp.stack([r_idx, zeros, rel, zeros, sub, obj], axis=1)

    old_nodes_new_idx = jnp.arange(n_prev, dtype=jnp.int32)  # unused (matches signature)

    ref = _reference(q_rel, hidden, edges, n_node, params)

    # 1) small tiles: multiple node tiles, multiple edge tiles, shared boundary tiles
    out_small = gnn_layer_forward(q_sub, q_rel, hidden, edges, n_node,
                                  old_nodes_new_idx, params, tile_e=256, tile_n=32)
    out_small = jax.block_until_ready(out_small)
    assert out_small.shape == (n_node, out_dim)
    err_s = jnp.max(jnp.abs(out_small - ref))
    assert jnp.allclose(out_small, ref, atol=5e-2, rtol=5e-2), \
        f"mismatch (small tiles) vs reference, max abs err {err_s}"

    # 2) perf-default tiles (single big edge tile, auto-split node axis)
    out_big = gnn_layer_forward(q_sub, q_rel, hidden, edges, n_node,
                                old_nodes_new_idx, params)
    out_big = jax.block_until_ready(out_big)
    assert out_big.shape == (n_node, out_dim)
    err_b = jnp.max(jnp.abs(out_big - ref))
    assert jnp.allclose(out_big, ref, atol=5e-2, rtol=5e-2), \
        f"mismatch (default tiles) vs reference, max abs err {err_b}"

    print("KERNEL_OK")
</pallas_src>

<mosaic_0001>
module attributes {stable_mosaic.version = 11 : i64} {
  func.func @gnn_layer_kernel(%arg0: i32, %arg1: i32, %arg2: memref<4xi32, #tpu.memory_space<smem>>, %arg3: memref<4xi32, #tpu.memory_space<smem>>, %arg4: memref<256x96xbf16, #tpu.memory_space<vmem>>, %arg5: memref<1x256xi32, #tpu.memory_space<vmem>>, %arg6: memref<96x128xbf16, #tpu.memory_space<vmem>>, %arg7: memref<1x128xf32, #tpu.memory_space<vmem>>, %arg8: memref<1x128xf32, #tpu.memory_space<vmem>>, %arg9: memref<32x128xf32, #tpu.memory_space<vmem>>, %arg10: memref<32x128xf32, #tpu.memory_space<vmem>>, %arg11: memref<32x32xf32, #tpu.memory_space<vmem>>) attributes {dimension_semantics = [#tpu.dimension_semantics<parallel>, #tpu.dimension_semantics<arbitrary>], iteration_bounds = array<i64: 4, 2>, scalar_prefetch = 2 : i64, scratch_operands = 1 : i64, tpu.core_type = #tpu.core_type<tc>, window_params = [{transform_indices = @transform_0, window_bounds = array<i64: 256, 96>}, {transform_indices = @transform_1, window_bounds = array<i64: 1, 256>}, {pipeline_mode = #tpu.pipeline_mode<synchronous>, transform_indices = @transform_2, window_bounds = array<i64: 96, 128>}, {pipeline_mode = #tpu.pipeline_mode<synchronous>, transform_indices = @transform_3, window_bounds = array<i64: 1, 128>}, {pipeline_mode = #tpu.pipeline_mode<synchronous>, transform_indices = @transform_4, window_bounds = array<i64: 1, 128>}, {pipeline_mode = #tpu.pipeline_mode<synchronous>, transform_indices = @transform_5, window_bounds = array<i64: 32, 128>}, {transform_indices = @transform_6, window_bounds = array<i64: 32, 128>}]} {
    %c0_i32 = arith.constant 0 : i32
    %0 = arith.cmpi eq, %arg1, %c0_i32 : i32
    %1 = arith.extui %0 : i1 to i32
    %c0_i32_0 = arith.constant 0 : i32
    %2 = arith.cmpi ne, %1, %c0_i32_0 : i32
    scf.if %2 {
      %cst = arith.constant 0.000000e+00 : f32
      %11 = vector.broadcast %cst : f32 to vector<32x32xf32>
      %c0 = arith.constant 0 : index
      %c0_3 = arith.constant 0 : index
      %12 = vector.load %arg11[%c0, %c0_3] : memref<32x32xf32, #tpu.memory_space<vmem>>, vector<32x32xf32>
      tpu.vector_store %arg11[%c0, %c0_3], %11 {strides = array<i32>} : memref<32x32xf32, #tpu.memory_space<vmem>>, vector<32x32xf32>,
    } else {
    }
    %3 = arith.index_cast %arg0 : i32 to index
    %4 = memref.load %arg3[%3] : memref<4xi32, #tpu.memory_space<smem>>
    %5 = arith.cmpi slt, %arg1, %4 : i32
    %6 = arith.extui %5 : i1 to i32
    %c0_i32_1 = arith.constant 0 : i32
    %7 = arith.cmpi ne, %6, %c0_i32_1 : i32
    scf.if %7 {
      %c0 = arith.constant 0 : index
      %c0_3 = arith.constant 0 : index
      %11 = vector.load %arg4[%c0, %c0_3] : memref<256x96xbf16, #tpu.memory_space<vmem>>, vector<256x96xbf16>
      %c0_4 = arith.constant 0 : index
      %c0_5 = arith.constant 0 : index
      %12 = vector.load %arg6[%c0_4, %c0_5] : memref<96x128xbf16, #tpu.memory_space<vmem>>, vector<96x128xbf16>
      %cst = arith.constant dense<0.000000e+00> : vector<256x128xf32>
      %13 = tpu.matmul %11, %12, %cst {dimension_numbers = #tpu.dot_dimension_numbers<[1], [0], [0], [1], [0, 0, 1, 1], [], []>} : vector<256x96xbf16>, vector<96x128xbf16>, vector<256x128xf32> -> vector<256x128xf32>
      %c0_6 = arith.constant 0 : index
      %c0_7 = arith.constant 0 : index
      %14 = vector.load %arg7[%c0_6, %c0_7] : memref<1x128xf32, #tpu.memory_space<vmem>>, vector<1x128xf32>
      %15 = vector.broadcast %14 : vector<1x128xf32> to vector<256x128xf32>
      %16 = arith.addf %13, %15 : vector<256x128xf32>
      %cst_8 = arith.constant 0.000000e+00 : f32
      %17 = vector.broadcast %cst_8 : f32 to vector<256x128xf32>
      %18 = arith.maximumf %16, %17 : vector<256x128xf32>
      %c0_9 = arith.constant 0 : index
      %c0_10 = arith.constant 0 : index
      %19 = vector.load %arg8[%c0_9, %c0_10] : memref<1x128xf32, #tpu.memory_space<vmem>>, vector<1x128xf32>
      %20 = vector.broadcast %19 : vector<1x128xf32> to vector<256x128xf32>
      %21 = arith.mulf %18, %20 : vector<256x128xf32>
      %cst_11 = arith.constant dense<0.000000e+00> : vector<256xf32>
      %22 = vector.multi_reduction <add>, %21, %cst_11 [1] : vector<256x128xf32> to vector<256xf32>
      %23 = vector.shape_cast %22 : vector<256xf32> to vector<256x1xf32>
      %24 = arith.negf %23 : vector<256x1xf32>
      %25 = math.exp %24 : vector<256x1xf32>
      %cst_12 = arith.constant 1.000000e+00 : f32
      %26 = vector.broadcast %cst_12 : f32 to vector<256x1xf32>
      %27 = arith.addf %26, %25 : vector<256x1xf32>
      %28 = arith.divf %26, %27 : vector<256x1xf32>
      %29 = vector.extract_strided_slice %11 {offsets = [0, 0], sizes = [256, 64], strides = [1, 1]} : vector<256x96xbf16> to vector<256x64xbf16>
      %30 = arith.extf %29 : vector<256x64xbf16> to vector<256x64xf32>
      %31 = vector.extract_strided_slice %30 {offsets = [0, 0], sizes = [256, 32], strides = [1, 1]} : vector<256x64xf32> to vector<256x32xf32>
      %32 = vector.extract_strided_slice %30 {offsets = [0, 32], sizes = [256, 32], strides = [1, 1]} : vector<256x64xf32> to vector<256x32xf32>
      %33 = arith.addf %31, %32 : vector<256x32xf32>
      %34 = vector.broadcast %28 : vector<256x1xf32> to vector<256x32xf32>
      %35 = arith.mulf %34, %33 : vector<256x32xf32>
      %36 = arith.truncf %35 : vector<256x32xf32> to vector<256x32xbf16>
      %c0_13 = arith.constant 0 : index
      %c0_14 = arith.constant 0 : index
      %37 = vector.load %arg5[%c0_13, %c0_14] : memref<1x256xi32, #tpu.memory_space<vmem>>, vector<1x256xi32>
      %c32_i32 = arith.constant 32 : i32
      %38 = arith.muli %arg0, %c32_i32 : i32
      %39 = vector.broadcast %38 : i32 to vector<1x256xi32>
      %40 = arith.subi %37, %39 : vector<1x256xi32>
      %41 = tpu.iota {dimensions = array<i32: 0>} : vector<32x256xi32>
      %42 = vector.broadcast %40 : vector<1x256xi32> to vector<32x256xi32>
      %43 = arith.cmpi eq, %41, %42 : vector<32x256xi32>
      %44 = arith.extui %43 : vector<32x256xi1> to vector<32x256xi32>
      %45 = arith.sitofp %44 : vector<32x256xi32> to vector<32x256xf32>
      %46 = arith.truncf %45 : vector<32x256xf32> to vector<32x256xbf16>
      %c0_15 = arith.constant 0 : index
      %c0_16 = arith.constant 0 : index
      %47 = vector.load %arg11[%c0_15, %c0_16] : memref<32x32xf32, #tpu.memory_space<vmem>>, vector<32x32xf32>
      %cst_17 = arith.constant dense<0.000000e+00> : vector<32x32xf32>
      %48 = tpu.matmul %46, %36, %cst_17 {dimension_numbers = #tpu.dot_dimension_numbers<[1], [0], [0], [1], [0, 0, 1, 1], [], []>} : vector<32x256xbf16>, vector<256x32xbf16>, vector<32x32xf32> -> vector<32x32xf32>
      %49 = arith.addf %47, %48 : vector<32x32xf32>
      %c0_18 = arith.constant 0 : index
      %c0_19 = arith.constant 0 : index
      %50 = vector.load %arg11[%c0_18, %c0_19] : memref<32x32xf32, #tpu.memory_space<vmem>>, vector<32x32xf32>
      tpu.vector_store %arg11[%c0_18, %c0_19], %49 {strides = array<i32>} : memref<32x32xf32, #tpu.memory_space<vmem>>, vector<32x32xf32>,
    } else {
    }
    %c1_i32 = arith.constant 1 : i32
    %8 = arith.cmpi eq, %arg1, %c1_i32 : i32
    %9 = arith.extui %8 : i1 to i32
    %c0_i32_2 = arith.constant 0 : i32
    %10 = arith.cmpi ne, %9, %c0_i32_2 : i32
    scf.if %10 {
      %c0 = arith.constant 0 : index
      %c0_3 = arith.constant 0 : index
      %11 = vector.load %arg11[%c0, %c0_3] : memref<32x32xf32, #tpu.memory_space<vmem>>, vector<32x32xf32>
      %c0_4 = arith.constant 0 : index
      %c0_5 = arith.constant 0 : index
      %12 = vector.load %arg9[%c0_4, %c0_5] : memref<32x128xf32, #tpu.memory_space<vmem>>, vector<32x128xf32>
      %cst = arith.constant dense<0.000000e+00> : vector<32x128xf32>
      %13 = tpu.matmul %11, %12, %cst {dimension_numbers = #tpu.dot_dimension_numbers<[1], [0], [0], [1], [0, 0, 1, 1], [], []>} : vector<32x32xf32>, vector<32x128xf32>, vector<32x128xf32> -> vector<32x128xf32>
      %c0_6 = arith.constant 0 : index
      %c0_7 = arith.constant 0 : index
      %14 = vector.load %arg10[%c0_6, %c0_7] : memref<32x128xf32, #tpu.memory_space<vmem>>, vector<32x128xf32>
      tpu.vector_store %arg10[%c0_6, %c0_7], %13 {strides = array<i32>} : memref<32x128xf32, #tpu.memory_space<vmem>>, vector<32x128xf32>,
    } else {
    }
    return
  }
  func.func @transform_0(%arg0: i32, %arg1: i32, %arg2: memref<4xi32, #tpu.memory_space<smem>>, %arg3: memref<4xi32, #tpu.memory_space<smem>>) -> (i32, i32) {
    %0 = arith.index_cast %arg0 : i32 to index
    %1 = memref.load %arg2[%0] : memref<4xi32, #tpu.memory_space<smem>>
    %2 = arith.index_cast %arg0 : i32 to index
    %3 = memref.load %arg3[%2] : memref<4xi32, #tpu.memory_space<smem>>
    %c1_i32 = arith.constant 1 : i32
    %4 = arith.subi %3, %c1_i32 : i32
    %c0_i32 = arith.constant 0 : i32
    %5 = arith.maxsi %4, %c0_i32 : i32
    %6 = arith.minsi %arg1, %5 : i32
    %7 = arith.addi %1, %6 : i32
    %c0_i32_0 = arith.constant 0 : i32
    %c0_i32_1 = arith.constant 0 : i32
    return %7, %c0_i32_0 : i32, i32
  }
  func.func @transform_1(%arg0: i32, %arg1: i32, %arg2: memref<4xi32, #tpu.memory_space<smem>>, %arg3: memref<4xi32, #tpu.memory_space<smem>>) -> (i32, i32) {
    %0 = arith.index_cast %arg0 : i32 to index
    %1 = memref.load %arg2[%0] : memref<4xi32, #tpu.memory_space<smem>>
    %2 = arith.index_cast %arg0 : i32 to index
    %3 = memref.load %arg3[%2] : memref<4xi32, #tpu.memory_space<smem>>
    %c1_i32 = arith.constant 1 : i32
    %4 = arith.subi %3, %c1_i32 : i32
    %c0_i32 = arith.constant 0 : i32
    %5 = arith.maxsi %4, %c0_i32 : i32
    %6 = arith.minsi %arg1, %5 : i32
    %7 = arith.addi %1, %6 : i32
    %c0_i32_0 = arith.constant 0 : i32
    %c0_i32_1 = arith.constant 0 : i32
    return %c0_i32_0, %7 : i32, i32
  }
  func.func @transform_2(%arg0: i32, %arg1: i32, %arg2: memref<4xi32, #tpu.memory_space<smem>>, %arg3: memref<4xi32, #tpu.memory_space<smem>>) -> (i32, i32) {
    %c0_i32 = arith.constant 0 : i32
    %c0_i32_0 = arith.constant 0 : i32
    %c0_i32_1 = arith.constant 0 : i32
    return %c0_i32, %c0_i32_0 : i32, i32
  }
  func.func @transform_3(%arg0: i32, %arg1: i32, %arg2: memref<4xi32, #tpu.memory_space<smem>>, %arg3: memref<4xi32, #tpu.memory_space<smem>>) -> (i32, i32) {
    %c0_i32 = arith.constant 0 : i32
    %c0_i32_0 = arith.constant 0 : i32
    %c0_i32_1 = arith.constant 0 : i32
    return %c0_i32, %c0_i32_0 : i32, i32
  }
  func.func @transform_4(%arg0: i32, %arg1: i32, %arg2: memref<4xi32, #tpu.memory_space<smem>>, %arg3: memref<4xi32, #tpu.memory_space<smem>>) -> (i32, i32) {
    %c0_i32 = arith.constant 0 : i32
    %c0_i32_0 = arith.constant 0 : i32
    %c0_i32_1 = arith.constant 0 : i32
    return %c0_i32, %c0_i32_0 : i32, i32
  }
  func.func @transform_5(%arg0: i32, %arg1: i32, %arg2: memref<4xi32, #tpu.memory_space<smem>>, %arg3: memref<4xi32, #tpu.memory_space<smem>>) -> (i32, i32) {
    %c0_i32 = arith.constant 0 : i32
    %c0_i32_0 = arith.constant 0 : i32
    %c0_i32_1 = arith.constant 0 : i32
    return %c0_i32, %c0_i32_0 : i32, i32
  }
  func.func @transform_6(%arg0: i32, %arg1: i32, %arg2: memref<4xi32, #tpu.memory_space<smem>>, %arg3: memref<4xi32, #tpu.memory_space<smem>>) -> (i32, i32) {
    %c0_i32 = arith.constant 0 : i32
    %c0_i32_0 = arith.constant 0 : i32
    return %arg0, %c0_i32 : i32, i32
  }
}

</mosaic_0001>

<bundles_post_ra>
// kernel: tpu_custom_call.1
= control target key start
LH: loop header
LB: loop body
LE: loop exit
PB: predicated region body
PF: predicated region fallthrough
CT: control target
= control target key end

     0   :  { %s3094_s0 = inlined_call_operand.vmem [shape: s32[4], index: 0, kind: input, shape index: {}]   ;;  %s3095_s2 = inlined_call_operand.vmem [shape: bf16[1024,96], index: 2, kind: input, shape index: {}]   ;;  %s3096_s3 = inlined_call_operand.vmem [shape: s32[1,1024], index: 3, kind: input, shape index: {}]   ;;  %s3097_s4 = inlined_call_operand.vmem [shape: bf16[96,128], index: 4, kind: input, shape index: {}]   ;;  %s3098_s5 = inlined_call_operand.vmem [shape: f32[1,128], index: 5, kind: input, shape index: {}]   ;;  %s3099_s6 = inlined_call_operand.vmem [shape: f32[1,128], index: 6, kind: input, shape index: {}]   ;;  %s3100_s7 = inlined_call_operand.vmem [shape: f32[32,128], index: 7, kind: input, shape index: {}]   ;;  %s3101_s8 = inlined_call_operand.hbm [shape: f32[128,128], index: 8, kind: output, shape index: {}]   ;;  %s3102_s1 = inlined_call_operand.vmem [shape: s32[4], index: 1, kind: input, shape index: {}]  }
   0x1   :  { %s13_s29 = sshll.u32 %s3094_s0, 4  ;;  %s17_s10 = sshll.u32 %s3102_s1, 4  ;;  %s14_s29 = int_to_ptr.vmem [resolvable:$true] %s13_s29  ;;  %s18_s10 = int_to_ptr.vmem [resolvable:$true] %s17_s10 }
   0x2   :  { %s2285_s11 = scalar_lea.vmem %s14_s29, 16  ;;  %p2290_p1 = scmp.lt.s32.totalorder %s14_s29, %s14_s29 }
   0x3   :  { %p2286_p0 = scmp.ne.s32.totalorder %s14_s29, %s2285_s11  ;;  %p2291_p2 = scmp.lt.s32.totalorder %s2285_s11, %s2285_s11 }
   0x5   :  { %p2292_p3 = por %p2291_p2, %p2290_p1 }
   0x7   :  { %p2293_p4 = pnand %p2292_p3, %p2286_p0 }
   0x9   :  { %2296 = shalt.err (!%p2293_p4)  }
   0xa   :  { %s2407_s12 = smov [#allocation4]   ;;  %s2297_s13 = scalar_lea.vmem %s18_s10, 16 }
   0xb   :  { %16 = dma.vmem_to_smem %s14_s29, 16, %s2407_s12, [#allocation3] }
   0xc   :  { %p2298_p5 = scmp.ne.s32.totalorder %s18_s10, %s2297_s13  ;;  %p2302_p6 = scmp.lt.s32.totalorder %s18_s10, %s18_s10 }
   0xd   :  { %p2303_p7 = scmp.lt.s32.totalorder %s2297_s13, %s2297_s13 }
   0xf   :  { %p2304_p8 = por %p2303_p7, %p2302_p6 }
  0x11   :  { %p2305_p9 = pnand %p2304_p8, %p2298_p5 }
  0x13   :  { %2308 = shalt.err (!%p2305_p9)  }
  0x14   :  { %s2408_s0 = smov [#allocation5]  }
  0x15   :  { %20 = dma.vmem_to_smem %s18_s10, 16, %s2408_s0, [#allocation3] }
  0x16   :  { %2369 = dma.done.wait [#allocation3], 32 }
  0x17   :  { %2370 = vsyncadd [#allocation3], 4294967264 }
  0x18   :  { %22 = sfence }
  0x19   :  { %23 = vsyncpa [#allocation7], 0 }
  0x1a   :  { %25 = vsyncpa [#allocation7 + $0x1], 0  ;;  %s2466_s1 = smov 0   ;;  %s2468_s14 = smov 0  }
  0x1b   :  { %s2470_s15 = smov 0   ;;  %s2472_s16 = smov 0  }
  0x1c   :  { %s2474_s17 = smov 0   ;;  %s2476_s18 = smov 0  }
  0x1d   :  { %s2478_s19 = smov 0   ;;  %s2480_s20 = smov 0  }
  0x1e LB: > { %3135 = sst [smem:[#allocation10_spill]] %s2397_s18  ;;  %s1684_s21 = sadd.s32 4294967295, %s2405_s20   ;;  %s2405_s20 = sphi %s2480_s20, %s31_s20   ;;  %s2401_s19 = sphi %s2478_s19, %s3180_s19   ;;  %s2397_s18 = sphi %s2476_s18, %s3179_s18   ;;  %s2393_s17 = sphi %s2474_s17, %s3178_s17   ;;  %s2389_s16 = sphi %s2472_s16, %s3177_s16   ;;  %s2385_s15 = sphi %s2470_s15, %s3183_s15   ;;  %s2381_s14 = sphi %s2468_s14, %s3182_s14   ;;  %s2377_s1 = sphi %s2466_s1, %s3181_s1  }
  0x1f   : > { %3136 = sst [smem:[#allocation11_spill]] %s2401_s19  ;;  %s1685_s22 = sadd.s32 4294967294, %s2405_s20  }
  0x20   : > { %s40_s23 = sadd.s32 1, %s2397_s18  ;;  %s43_s24 = sadd.s32 1, %s2401_s19 }
  0x21   : > { %p41_p10 = scmp.ge.s32.totalorder %s40_s23, 2  ;;  %p228_p11 = scmp.ne.s32.totalorder %s2385_s15, %s2381_s14 }
  0x22   : > { %p229_p12 = scmp.eq.s32.totalorder %s1684_s21, 7  ;;  %p234_p0 = scmp.ne.s32.totalorder %s2381_s14, %s2377_s1 }
  0x23   : > { %s3185_s23 = smov (%p41_p10, %s40_s23), 0  ;;  %s3187_s24 = smov (!%p41_p10, %s43_s24), %s2401_s19 }
  0x24   : > { %3137 = sst [smem:[#allocation12_spill]] %s3185_s23  ;;  %p2515_p13 = por %p229_p12, %p228_p11 }
  0x25   : > { %p45_p1 = scmp.ge.s32.totalorder %s3187_s24, 4  ;;  %p235_p2 = scmp.eq.s32.totalorder %s1685_s22, 7 }
  0x26   : > { %p1692_p3 = scmp.ge.s32.totalorder %s2405_s20, 1  ;;  %p314_p4 = scmp.lt.s32.totalorder %s2405_s20, 9 }
  0x27   : > { %s3189_s24 = smov (%p45_p1, %s3187_s24), 0  ;;  %p2525_p5 = por %p235_p2, %p234_p0 }
  0x28   : > { %3139 = sst [smem:[#allocation13_spill]] %s3189_s24  ;;  %p315_p6 = pnand %p1692_p3, %p314_p4 }
  0x29   : > { %s215_s27 = ssub.s32 %s2401_s19, %s3189_s24  ;;  %s218_s28 = sadd.s32 1, %s2385_s15 }
  0x2a   : > { %p216_p7 = scmp.eq.s32.totalorder %s215_s27, 0  ;;  %318 = sbr.rel (%p315_p6) target bundleno = 1090 (0x442), region = 44 }
  0x2b   : > { %s3104_s30 = sand.u32 (!%p315_p6), 1, %s2381_s14   ;;  %s365_s10 = sld [smem:[#allocation5 + %s2393_s17]] (!%p315_p6) }
  0x2c   : > { %s2533_s29 = scalar_select %p216_p7, %s2385_s15, %s218_s28  }
  0x2d   : > { %s1693_s9 = sshll.u32 (!%p315_p6), %s3104_s30, 5  ;;  %s387_s11 = sld [smem:[#allocation5 + %s2393_s17]] (!%p315_p6) }
  0x2e   : > { %3141 = sst [smem:[#allocation14_spill]] %s2533_s29  ;;  %p1699_p1 = scmp.ne.s32.totalorder (!%p315_p6), %s2389_s16, 0 }
  0x2f   : > { %s364_s13 = sld [smem:[#allocation4 + %s2393_s17]] (!%p315_p6) }
  0x30   : > { %s386_s21 = sld [smem:[#allocation4 + %s2393_s17]] (!%p315_p6) }
  0x31   : > { %s1694_s12 = sadd.s32 4294967295, %s365_s10  ;;  %vm413_vm0 = vcmask (!%p1699_p1), 261120   ;;  %v2409_v0 = vmov (!%p1699_p1), 0.0  }
  0x32   : > { %p367_p8 = scmp.gt.s32.totalorder %s1694_s12, 0  ;;  %414 = vst.msk [vmem:[#allocation2] sm:$0xff] (!%p1699_p1), %vm413_vm0, %v2409_v0  ;;  %415 = vst.msk [vmem:[#allocation2 + $0x8] sm:$0xff] (!%p1699_p1), %vm413_vm0, %v2409_v0 }
  0x33   : > { %s1697_s0 = sadd.s32 4294967295, %s387_s11  ;;  %416 = vst.msk [vmem:[#allocation2 + $0x10] sm:$0xff] (!%p1699_p1), %vm413_vm0, %v2409_v0  ;;  %417 = vst.msk [vmem:[#allocation2 + $0x18] sm:$0xff] (!%p1699_p1), %vm413_vm0, %v2409_v0 }
  0x34   : > { %s3191_s12 = smov (!%p367_p8, %s1694_s12), 0  ;;  %p389_p9 = scmp.gt.s32.totalorder %s1697_s0, 0 }
  0x35   : > { %p369_p10 = scmp.lt.s32.totalorder %s2389_s16, %s3191_s12 }
  0x36   : > { %s3193_s0 = smov (!%p389_p9, %s1697_s0), 0 }
  0x37   : > { %s370_s22 = scalar_select %p369_p10, %s2389_s16, %s3191_s12 }
  0x38   : > { %p391_p11 = scmp.lt.s32.totalorder %s2389_s16, %s3193_s0 }
  0x39   : > { %s371_s27 = sadd.s32 %s370_s22, %s364_s13  ;;  %s2557_s22 = scalar_lea.vmem [#allocation6], %s1693_s9 }
  0x3a   : > { %s1695_s28 = sshll.u32 %s371_s27, 5 }
  0x3b   : > { %p373_p12 = scmp.lt.s32.totalorder %s1695_s28, 127 }
  0x3c   : > { %s392_s24 = scalar_select %p391_p11, %s2389_s16, %s3193_s0 }
  0x3d   : > { %s3195_s28 = smov (!%p373_p12, %s1695_s28), 127  ;;  %412 = sbr.rel (%p1699_p1) target bundleno = 68 (0x44), region = 48 }
  0x3e   : > { %s393_s30 = sadd.s32 %s392_s24, %s386_s21  ;;  %s1696_s23 = sshll.u32 %s3195_s28, 2 }
  0x3f   : > { %s1698_s19 = sshll.u32 %s393_s30, 1  ;;  %s2549_s29 = scalar_lea.vmem %s3095_s2, %s1696_s23 }
  0x40   : > { %p395_p0 = scmp.lt.s32.totalorder %s1698_s19, 7 }
  0x42   : > { %s3197_s19 = smov (!%p395_p0, %s1698_s19), 7 }
  0x43   : > { %s397_s13 = scalar_lea.vmem %s3096_s3, %s3197_s19 }
  0x44 PF: > { %s418_s18 = sld [smem:[#allocation5 + %s2393_s17]] }
  0x4a   : > { %p1700_p2 = scmp.ge.s32.totalorder %s2389_s16, %s418_s18 }
  0x4b   : > { %v2087_v1 = vld [vmem:[%s3097_s4] sm:$0xff] (!%p1700_p2)   ;;  %v2088_v2 = vld [vmem:[%s3097_s4 + $0x8] sm:$0xff] (!%p1700_p2)   ;;  %v2089_v3 = vld [vmem:[%s3097_s4 + $0x10] sm:$0xff] (!%p1700_p2)   ;;  %vm590_vm1 = vcmask (!%p1700_p2), 785408   ;;  %s2410_s12 = smov (!%p1700_p2), 96   ;;  %vm1469_vm14 = vcmask (!%p1700_p2), 261120  }
  0x4c   : > { %422 = sbr.rel (%p1700_p2) target bundleno = 837 (0x345), region = 52  ;;  %1859 = vmatprep.subr.bf16.mxu0 (!%p1700_p2), %v2087_v1  ;;  %v2572_v4 = vld [vmem:[%s2549_s29] sm:$0xff] (!%p1700_p2)   ;;  %v2090_v6 = vld [vmem:[%s3097_s4 + $0x18] sm:$0xff] (!%p1700_p2)   ;;  %v2582_v8 = vld [vmem:[%s2549_s29 + $0x48] sm:$0xff] (!%p1700_p2)  }
  0x4d   : > { %1860 = vmatpush3.bf16.msra.mxu0 (!%p1700_p2), %v2087_v1  ;;  %v1127_v5 = vunpack.c.l.bf16 (!%p1700_p2), %v2572_v4  ;;  %v1128_v7 = vunpack.c.h.bf16 (!%p1700_p2), %v2572_v4  ;;  %1871 = vmatprep.mubr.msk.bf16.mxu0 (!%p1700_p2), %vm590_vm1, %v2572_v4  ;;  %v2589_v10 = vld [vmem:[%s2549_s29 + $0x8] sm:$0xff] (!%p1700_p2)   ;;  %v2592_v11 = vld [vmem:[%s2549_s29 + $0x40] sm:$0xff] (!%p1700_p2)   ;;  %v1145_v12 = vunpack.c.l.bf16 (!%p1700_p2), %v2582_v8  ;;  %v2599_v14 = vld [vmem:[%s2549_s29 + $0x50] sm:$0xff] (!%p1700_p2)   ;;  %v1146_v15 = vunpack.c.h.bf16 (!%p1700_p2), %v2582_v8 }
  0x4e   : > { %1861 = vmatprep.subr.bf16.mxu0 (!%p1700_p2), %v2088_v2  ;;  %v2091_v13 = vld [vmem:[%s3097_s4 + $0x20] sm:$0xff] (!%p1700_p2)   ;;  %v1129_v16 = vunpack.c.l.bf16 (!%p1700_p2), %v2589_v10  ;;  %v1130_v17 = vunpack.c.h.bf16 (!%p1700_p2), %v2589_v10  ;;  %v3133_v18 = vunpack.c.l.bf16 (!%p1700_p2), %v2592_v11  ;;  %v3134_v19 = vunpack.c.h.bf16 (!%p1700_p2), %v2592_v11  ;;  %v2614_v23 = vld [vmem:[%s2549_s29 + $0x10] sm:$0xff] (!%p1700_p2)   ;;  %v2092_v25 = vld [vmem:[%s3097_s4 + $0x28] sm:$0xff] (!%p1700_p2)  }
  0x4f   : > { %v2012_v9 = vpack.i.bf16 (!%p1700_p2), %v1128_v7, %v1127_v5  ;;  %v3129_v20 = vunpack.c.l.bf16 (!%p1700_p2), %v2599_v14  ;;  %v2017_v21 = vpack.i.bf16 (!%p1700_p2), %v1146_v15, %v1145_v12  ;;  %v3130_v22 = vunpack.c.h.bf16 (!%p1700_p2), %v2599_v14  ;;  %v2624_v26 = vld [vmem:[%s2549_s29 + $0x58] sm:$0xff] (!%p1700_p2)   ;;  %v2666_v39 = vld [vmem:[%s2549_s29 + $0x20] sm:$0xff] (!%p1700_p2)   ;;  %v2674_v40 = vld [vmem:[%s2549_s29 + $0x28] sm:$0xff] (!%p1700_p2)  }
  0x50   : > { %v2007_v24 = vpack.i.bf16 (!%p1700_p2), %v3134_v19, %v3133_v18  ;;  %v2022_v27 = vpack.i.bf16 (!%p1700_p2), %v1130_v17, %v1129_v16  ;;  %v3131_v28 = vunpack.c.l.bf16 (!%p1700_p2), %v2614_v23  ;;  %v3132_v29 = vunpack.c.h.bf16 (!%p1700_p2), %v2614_v23  ;;  %v2641_v33 = vld [vmem:[%s2549_s29 + $0x18] sm:$0xff] (!%p1700_p2)   ;;  %v2677_v41 = vld [vmem:[%s2549_s29 + $0x30] sm:$0xff] (!%p1700_p2)   ;;  %v2695_v43 = vld [vmem:[%s2549_s29 + $0x60] sm:$0xff] (!%p1700_p2)  }
  0x51   : > { %1862 = vmatpush3.bf16.msra.mxu0 (!%p1700_p2), %v2088_v2  ;;  %2013 = vrot.lane.b32.xlu1 (!%p1700_p2), %v2012_v9, %s2410_s12  ;;  %v2027_v30 = vpack.i.bf16 (!%p1700_p2), %v3130_v22, %v3129_v20  ;;  %v3127_v31 = vunpack.c.l.bf16 (!%p1700_p2), %v2624_v26  ;;  %v3128_v32 = vunpack.c.h.bf16 (!%p1700_p2), %v2624_v26  ;;  %v3123_v35 = vunpack.c.l.bf16 (!%p1700_p2), %v2641_v33  ;;  %v2684_v42 = vld [vmem:[%s2549_s29 + $0x38] sm:$0xff] (!%p1700_p2)   ;;  %v2702_v44 = vld [vmem:[%s2549_s29 + $0x68] sm:$0xff] (!%p1700_p2)   ;;  %v2705_v45 = vld [vmem:[%s2549_s29 + $0x70] sm:$0xff] (!%p1700_p2)  }
  0x52   : > { %1863 = vmatprep.subr.bf16.mxu0 (!%p1700_p2), %v2089_v3  ;;  %2008 = vrot.lane.b32.xlu0 (!%p1700_p2), %v2007_v24, %s2410_s12  ;;  %v2032_v34 = vpack.i.bf16 (!%p1700_p2), %v3132_v29, %v3131_v28  ;;  %v3126_v36 = vunpack.c.h.bf16 (!%p1700_p2), %v2641_v33  ;;  %v2712_v46 = vld [vmem:[%s2549_s29 + $0x78] sm:$0xff] (!%p1700_p2)   ;;  %v2719_v47 = vld [vmem:[%s3098_s5] ss:$0 sm:$0xff] (!%p1700_p2)  ;;  %s1773_s29 = sshll.u32 (!%p1700_p2), %s2393_s17, 5 }
  0x53   : > { %v2037_v37 = vpack.i.bf16 %v3128_v32, %v3127_v31  ;;  %v2726_v53 = vld [vmem:[%s3099_s6] ss:$0 sm:$0xff] }
  0x54   : > { %v2042_v38 = vpack.i.bf16 %v3126_v36, %v3123_v35 }
  0x55   : > { %1864 = vmatpush3.bf16.msra.mxu0 %v2089_v3  ;;  %2018 = vrot.lane.b32.xlu1 %v2017_v21, %s2410_s12 }
  0x56   : > { %1865 = vmatprep.subr.bf16.mxu0 %v2090_v6  ;;  %2028 = vrot.lane.b32.xlu0 %v2027_v30, %s2410_s12 }
  0x59   : > { %1866 = vmatpush3.bf16.msra.mxu0 %v2090_v6  ;;  %2023 = vrot.lane.b32.xlu1 %v2022_v27, %s2410_s12 }
  0x5a   : > { %1867 = vmatprep.subr.bf16.mxu0 %v2091_v13  ;;  %2038 = vrot.lane.b32.xlu0 %v2037_v37, %s2410_s12 }
  0x5d   : > { %1868 = vmatpush3.bf16.msra.mxu0 %v2091_v13  ;;  %2033 = vrot.lane.b32.xlu1 %v2032_v34, %s2410_s12 }
  0x5e   : > { %1869 = vmatprep.subr.bf16.mxu0 %v2092_v25 }
  0x61   : > { %1870 = vmatpush3.bf16.msra.mxu0 %v2092_v25  ;;  %2043 = vrot.lane.b32.xlu1 %v2042_v38, %s2410_s12 }
  0x64   : > { %1872 = vmatmul.mubr.msk.bf16.vlgmr.msra.gmra.mrb[0].mxu0 %vm590_vm1, %v2589_v10  ;;  %v3149_v10 = vunpack.c.l.bf16 %v2592_v11 }
  0x65   : > { %1875 = vmatprep.mubr.msk.bf16.mxu0 %vm590_vm1, %v2614_v23 }
  0x6c   : > { %1876 = vmatmul.mubr.msk.bf16.gmra.mrb[4].mxu0 %vm590_vm1, %v2641_v33 }
  0x6d   : > { %1879 = vmatprep.mubr.msk.bf16.mxu0 %vm590_vm1, %v2666_v39 }
  0x74   : > { %1880 = vmatmul.mubr.msk.bf16.gmra.mrb[8].mxu0 %vm590_vm1, %v2674_v40 }
  0x75   : > { %1883 = vmatprep.mubr.msk.bf16.mxu0 %vm590_vm1, %v2677_v41 }
  0x7c   : > { %1884 = vmatmul.mubr.msk.bf16.gmra.mrb[12].mxu0 %vm590_vm1, %v2684_v42 }
  0x7d   : > { %1887 = vmatprep.mubr.msk.bf16.mxu0 %vm590_vm1, %v2592_v11 }
  0x84   : > { %1888 = vmatmul.mubr.msk.bf16.gmra.mrb[16].mxu0 %vm590_vm1, %v2582_v8 }
  0x85   : > { %1891 = vmatprep.mubr.msk.bf16.mxu0 %vm590_vm1, %v2599_v14 }
  0x8c   : > { %1892 = vmatmul.mubr.msk.bf16.gmra.mrb[20].mxu0 %vm590_vm1, %v2624_v26 }
  0x8d   : > { %1895 = vmatprep.mubr.msk.bf16.mxu0 %vm590_vm1, %v2695_v43 }
  0x94   : > { %1896 = vmatmul.mubr.msk.bf16.gmra.mrb[24].mxu0 %vm590_vm1, %v2702_v44 }
  0x95   : > { %1899 = vmatprep.mubr.msk.bf16.mxu0 %vm590_vm1, %v2705_v45 }
  0x9c   : > { %1900 = vmatmul.mubr.msk.bf16.gmra.mrb[28].mxu0 %vm590_vm1, %v2712_v46 }
 0x137   : > { %v1873_v48 = vpop.f32.mrb[0].mxu0 }
 0x138   : > { %v682_v49 = vadd.f32 %v1873_v48, %v2719_v47  ;;  %v673_v50 = vpop.f32.mrb[1].mxu0 }
 0x139   : > { %v674_v51 = vadd.f32 %v2719_v47, %v673_v50  ;;  %v1874_v52 = vpop.f32.mrb[2].mxu0 }
 0x13a   : > { %v802_v54 = vmax.f32 %v682_v49, 0.0  ;;  %v685_v55 = vadd.f32 %v1874_v52, %v2719_v47  ;;  %v676_v56 = vpop.f32.mrb[3].mxu0 }
 0x13b   : > { %v800_v57 = vmax.f32 %v674_v51, 0.0  ;;  %v677_v60 = vadd.f32 %v2719_v47, %v676_v56 }
 0x13c   : > { %v841_v58 = vmul.f32 %v2726_v53, %v802_v54  ;;  %v803_v59 = vmax.f32 %v685_v55, 0.0 }
 0x13d   : > { %v839_v61 = vmul.f32 %v2726_v53, %v800_v57  ;;  %v801_v1 = vmax.f32 %v677_v60, 0.0 }
 0x13e   : > { %875 = vadd.xlane.f32.xlu0 %v841_v58  ;;  %v842_v6 = vmul.f32 %v2726_v53, %v803_v59 }
 0x13f   : > { %v1877_v62 = vpop.f32.mrb[4].mxu0  ;;  %871 = vadd.xlane.f32.xlu1 %v839_v61  ;;  %v840_v34 = vmul.f32 %v2726_v53, %v801_v1 }
 0x140   : > { %v698_v63 = vadd.f32 %v1877_v62, %v2719_v47  ;;  %v689_v0 = vpop.f32.mrb[5].mxu0 }
 0x141   : > { %v690_v2 = vadd.f32 %v2719_v47, %v689_v0  ;;  %v1878_v3 = vpop.f32.mrb[6].mxu0 }
 0x142   : > { %v806_v9 = vmax.f32 %v698_v63, 0.0  ;;  %v701_v13 = vadd.f32 %v1878_v3, %v2719_v47  ;;  %v692_v21 = vpop.f32.mrb[7].mxu0 }
 0x143   : > { %877 = vadd.xlane.f32.xlu1 %v842_v6  ;;  %v804_v24 = vmax.f32 %v690_v2, 0.0  ;;  %v693_v30 = vadd.f32 %v2719_v47, %v692_v21 }
 0x144   : > { %v845_v25 = vmul.f32 %v2726_v53, %v806_v9  ;;  %v807_v27 = vmax.f32 %v701_v13, 0.0 }
 0x145   : > { %v843_v49 = vmul.f32 %v2726_v53, %v804_v24  ;;  %v805_v50 = vmax.f32 %v693_v30, 0.0 }
 0x146   : > { %883 = vadd.xlane.f32.xlu0 %v845_v25  ;;  %v846_v54 = vmul.f32 %v2726_v53, %v807_v27 }
 0x147   : > { %v1881_v37 = vpop.f32.mrb[8].mxu0  ;;  %873 = vadd.xlane.f32.xlu1 %v840_v34  ;;  %v844_v62 = vmul.f32 %v2726_v53, %v805_v50 }
 0x148   : > { %v714_v38 = vadd.f32 %v1881_v37, %v2719_v47  ;;  %v705_v48 = vpop.f32.mrb[9].mxu0 }
 0x149   : > { %v706_v51 = vadd.f32 %v2719_v47, %v705_v48  ;;  %v1882_v52 = vpop.f32.mrb[10].mxu0 }
 0x14a   : > { %v810_v55 = vmax.f32 %v714_v38, 0.0  ;;  %v717_v56 = vadd.f32 %v1882_v52, %v2719_v47  ;;  %v708_v57 = vpop.f32.mrb[11].mxu0  ;;  %879 = vadd.xlane.f32.xlu0 %v843_v49 }
 0x14b   : > { %885 = vadd.xlane.f32.xlu1 %v846_v54  ;;  %v808_v58 = vmax.f32 %v706_v51, 0.0  ;;  %v709_v61 = vadd.f32 %v2719_v47, %v708_v57 }
 0x14c   : > { %v849_v59 = vmul.f32 %v2726_v53, %v810_v55  ;;  %v811_v60 = vmax.f32 %v717_v56, 0.0 }
 0x14d   : > { %v847_v2 = vmul.f32 %v2726_v53, %v808_v58  ;;  %v809_v3 = vmax.f32 %v709_v61, 0.0 }
 0x14e   : > { %891 = vadd.xlane.f32.xlu0 %v849_v59  ;;  %v850_v13 = vmul.f32 %v2726_v53, %v811_v60 }
 0x14f   : > { %v1885_v63 = vpop.f32.mrb[12].mxu0  ;;  %881 = vadd.xlane.f32.xlu1 %v844_v62  ;;  %v848_v38 = vmul.f32 %v2726_v53, %v809_v3 }
 0x150   : > { %v730_v0 = vadd.f32 %v1885_v63, %v2719_v47  ;;  %v721_v1 = vpop.f32.mrb[13].mxu0 }
 0x151   : > { %v722_v6 = vadd.f32 %v2719_v47, %v721_v1  ;;  %v1886_v9 = vpop.f32.mrb[14].mxu0 }
 0x152   : > { %v814_v21 = vmax.f32 %v730_v0, 0.0  ;;  %v733_v24 = vadd.f32 %v1886_v9, %v2719_v47  ;;  %v724_v25 = vpop.f32.mrb[15].mxu0  ;;  %887 = vadd.xlane.f32.xlu0 %v847_v2 }
 0x153   : > { %893 = vadd.xlane.f32.xlu1 %v850_v13  ;;  %v812_v27 = vmax.f32 %v722_v6, 0.0  ;;  %v725_v37 = vadd.f32 %v2719_v47, %v724_v25 }
 0x154   : > { %v853_v30 = vmul.f32 %v2726_v53, %v814_v21  ;;  %v815_v34 = vmax.f32 %v733_v24, 0.0 }
 0x155   : > { %v851_v51 = vmul.f32 %v2726_v53, %v812_v27  ;;  %v813_v52 = vmax.f32 %v725_v37, 0.0 }
 0x156   : > { %899 = vadd.xlane.f32.xlu0 %v853_v30  ;;  %v854_v56 = vmul.f32 %v2726_v53, %v815_v34 }
 0x157   : > { %v1889_v48 = vpop.f32.mrb[16].mxu0  ;;  %889 = vadd.xlane.f32.xlu1 %v848_v38  ;;  %v852_v0 = vmul.f32 %v2726_v53, %v813_v52 }
 0x158   : > { %v746_v49 = vadd.f32 %v1889_v48, %v2719_v47  ;;  %v737_v50 = vpop.f32.mrb[17].mxu0 }
 0x159   : > { %v738_v54 = vadd.f32 %v2719_v47, %v737_v50  ;;  %v1890_v55 = vpop.f32.mrb[18].mxu0 }
 0x15a   : > { %v818_v57 = vmax.f32 %v746_v49, 0.0  ;;  %v749_v58 = vadd.f32 %v1890_v55, %v2719_v47  ;;  %v740_v59 = vpop.f32.mrb[19].mxu0  ;;  %895 = vadd.xlane.f32.xlu0 %v851_v51 }
 0x15b   : > { %901 = vadd.xlane.f32.xlu1 %v854_v56  ;;  %v816_v60 = vmax.f32 %v738_v54, 0.0  ;;  %v741_v61 = vadd.f32 %v2719_v47, %v740_v59 }
 0x15c   : > { %v857_v62 = vmul.f32 %v2726_v53, %v818_v57  ;;  %v819_v63 = vmax.f32 %v749_v58, 0.0 }
 0x15d   : > { %v817_v2 = vmax.f32 %v741_v61, 0.0  ;;  %v855_v9 = vmul.f32 %v2726_v53, %v816_v60 }
 0x15e   : > { %907 = vadd.xlane.f32.xlu0 %v857_v62  ;;  %v858_v21 = vmul.f32 %v2726_v53, %v819_v63 }
 0x15f   : > { %v1893_v1 = vpop.f32.mrb[20].mxu0  ;;  %897 = vadd.xlane.f32.xlu1 %v852_v0  ;;  %v856_v38 = vmul.f32 %v2726_v53, %v817_v2 }
 0x160   : > { %v762_v3 = vadd.f32 %v1893_v1, %v2719_v47  ;;  %v753_v6 = vpop.f32.mrb[21].mxu0 }
 0x161   : > { %v1894_v13 = vpop.f32.mrb[22].mxu0  ;;  %v754_v34 = vadd.f32 %v2719_v47, %v753_v6 }
 0x162   : > { %v765_v24 = vadd.f32 %v1894_v13, %v2719_v47  ;;  %v756_v25 = vpop.f32.mrb[23].mxu0  ;;  %903 = vadd.xlane.f32.xlu0 %v855_v9  ;;  %v822_v30 = vmax.f32 %v762_v3, 0.0 }
 0x163   : > { %v757_v27 = vadd.f32 %v2719_v47, %v756_v25  ;;  %909 = vadd.xlane.f32.xlu1 %v858_v21  ;;  %v820_v51 = vmax.f32 %v754_v34, 0.0 }
 0x164   : > { %v823_v37 = vmax.f32 %v765_v24, 0.0  ;;  %v861_v55 = vmul.f32 %v2726_v53, %v822_v30 }
 0x165   : > { %v821_v48 = vmax.f32 %v757_v27, 0.0  ;;  %v859_v0 = vmul.f32 %v2726_v53, %v820_v51 }
 0x166   : > { %905 = vadd.xlane.f32.xlu0 %v856_v38  ;;  %v862_v49 = vmul.f32 %v2726_v53, %v823_v37 }
 0x167   : > { %v1897_v50 = vpop.f32.mrb[24].mxu0  ;;  %v860_v59 = vmul.f32 %v2726_v53, %v821_v48 }
 0x168   : > { %v778_v52 = vadd.f32 %v1897_v50, %v2719_v47  ;;  %v769_v54 = vpop.f32.mrb[25].mxu0  ;;  %917 = vadd.xlane.f32.xlu1 %v862_v49 }
 0x169   : > { %v1898_v56 = vpop.f32.mrb[26].mxu0  ;;  %v770_v62 = vadd.f32 %v2719_v47, %v769_v54 }
 0x16a   : > { %v781_v57 = vadd.f32 %v1898_v56, %v2719_v47  ;;  %v772_v58 = vpop.f32.mrb[27].mxu0  ;;  %915 = vadd.xlane.f32.xlu0 %v861_v55  ;;  %v826_v61 = vmax.f32 %v778_v52, 0.0 }
 0x16b   : > { %v773_v60 = vadd.f32 %v2719_v47, %v772_v58  ;;  %v824_v6 = vmax.f32 %v770_v62, 0.0  ;;  %v3122_v58 = vunpack.c.h.bf16 %v2666_v39  ;;  %v3117_v62 = vunpack.c.h.bf16 %v2702_v44 }
 0x16c   : > { %v827_v63 = vmax.f32 %v781_v57, 0.0  ;;  %913 = vadd.xlane.f32.xlu1 %v860_v59  ;;  %v865_v9 = vmul.f32 %v2726_v53, %v826_v61  ;;  %v3121_v57 = vunpack.c.l.bf16 %v2666_v39  ;;  %v3119_v59 = vunpack.c.l.bf16 %v2695_v43 }
 0x16d   : > { %v825_v1 = vmax.f32 %v773_v60, 0.0  ;;  %v863_v49 = vmul.f32 %v2726_v53, %v824_v6  ;;  %v3120_v60 = vunpack.c.h.bf16 %v2695_v43  ;;  %v3118_v61 = vunpack.c.l.bf16 %v2702_v44 }
 0x16e   : > { %911 = vadd.xlane.f32.xlu0 %v859_v0  ;;  %v866_v2 = vmul.f32 %v2726_v53, %v827_v63  ;;  %v3109_v0 = vunpack.c.l.bf16 %v2705_v45  ;;  %v3108_v6 = vunpack.c.h.bf16 %v2712_v46 }
 0x16f   : > { %v1901_v3 = vpop.f32.mrb[28].mxu0  ;;  %v864_v30 = vmul.f32 %v2726_v53, %v825_v1  ;;  %v2057_v63 = vpack.i.bf16 %v3117_v62, %v3118_v61  ;;  %v3110_v1 = vunpack.c.h.bf16 %v2705_v45 }
 0x170   : > { %925 = vadd.xlane.f32.xlu1 %v866_v2  ;;  %v794_v13 = vadd.f32 %v1901_v3, %v2719_v47  ;;  %v785_v21 = vpop.f32.mrb[29].mxu0  ;;  %v3107_v3 = vunpack.c.l.bf16 %v2712_v46 }
 0x171   : > { %v786_v24 = vadd.f32 %v2719_v47, %v785_v21  ;;  %v1902_v25 = vpop.f32.mrb[30].mxu0  ;;  %v2067_v2 = vpack.i.bf16 %v3110_v1, %v3109_v0 }
 0x172   : > { %923 = vadd.xlane.f32.xlu0 %v865_v9  ;;  %v830_v27 = vmax.f32 %v794_v13, 0.0  ;;  %v797_v34 = vadd.f32 %v1902_v25, %v2719_v47  ;;  %v788_v37 = vpop.f32.mrb[31].mxu0  ;;  %v2077_v9 = vpack.i.bf16 %v3108_v6, %v3107_v3  ;;  %v2825_v13 = vpop.permute.xlu1 %2013  ;;  %v3116_v25 = vunpack.c.h.bf16 %v2674_v40 }
 0x173   : > { %v828_v38 = vmax.f32 %v786_v24, 0.0  ;;  %v789_v48 = vadd.f32 %v2719_v47, %v788_v37  ;;  %v2052_v47 = vpack.i.bf16 %v3122_v58, %v3121_v57  ;;  %v3115_v24 = vunpack.c.l.bf16 %v2674_v40 }
 0x174   : > { %921 = vadd.xlane.f32.xlu1 %v864_v30  ;;  %v831_v50 = vmax.f32 %v797_v34, 0.0  ;;  %v869_v54 = vmul.f32 %v2726_v53, %v830_v27  ;;  %v3113_v30 = vunpack.c.l.bf16 %v2677_v41  ;;  %v3114_v34 = vunpack.c.h.bf16 %v2677_v41 }
 0x175   : > { %v867_v51 = vmul.f32 %v2726_v53, %v828_v38  ;;  %v829_v52 = vmax.f32 %v789_v48, 0.0  ;;  %v2062_v27 = vpack.i.bf16 %v3116_v25, %v3115_v24  ;;  %v3111_v48 = vunpack.c.l.bf16 %v2684_v42 }
 0x176   : > { %919 = vadd.xlane.f32.xlu0 %v863_v49  ;;  %v870_v55 = vmul.f32 %v2726_v53, %v831_v50  ;;  %v2827_v21 = vpop.permute.xlu1 %2018  ;;  %v2072_v38 = vpack.i.bf16 %v3114_v34, %v3113_v30  ;;  %v3112_v49 = vunpack.c.h.bf16 %v2684_v42  ;;  %v2846_v50 = vpop.permute.xlu0 %2008  ;;  %v1371_v3 = vlaneseq }
 0x177   : > { %v868_v56 = vmul.f32 %v2726_v53, %v829_v52  ;;  %v2047_v53 = vpack.i.bf16 %v3120_v60, %v3119_v59  ;;  %v1369_v30 = vstv %s1773_s29 }
 0x178   : > { %v2082_v52 = vpack.i.bf16 %v3112_v49, %v3111_v48  ;;  %v1372_v48 = vshrl.u32 %v1371_v3, 7  ;;  %v1367_v49 = vld [vmem:[%s397_s13] sm:$0x3] }
 0x179   : > { %v1370_v34 = vsub.s32 %v1367_v49, %v1369_v30  ;;  %v3124_v30 = vmov 1.0|1.0  }
 0x17a   : > { %931 = vadd.xlane.f32.xlu0 %v869_v54  ;;  %v2837_v37 = vpop.permute.xlu1 %2023  ;;  %v2855_v54 = vpop.permute.xlu0 %2028  ;;  %v1373_v25 = vadd.s32 8, %v1372_v48  ;;  %v1382_v62 = vsub.s32 1, %v1372_v48  ;;  %v1378_v61 = vsub.s32 0, %v1372_v48  ;;  %v1374_v57 = vadd.s32 16, %v1372_v48 }
 0x17b   : > { %v1375_v3 = vadd.s32 24, %v1372_v48  ;;  %v2258_v4 = vadd.low.f32.bf16 %v1129_v16, %v2837_v37  ;;  %v2260_v16 = vadd.low.f32.bf16 %v3149_v10, %v2846_v50 }
 0x17c   : > { %v1379_v60 = vrot.slane %v1370_v34, %v1378_v61 }
 0x17e   : > { %927 = vadd.xlane.f32.xlu0 %v867_v51  ;;  %v2848_v51 = vpop.permute.xlu1 %2033  ;;  %vm1384_vm4 = vcmp.eq.s32.totalorder %v1372_v48, %v1379_v60  ;;  %vm1386_vm6 = vcmp.eq.s32.totalorder %v1373_v25, %v1379_v60  ;;  %vm1388_vm11 = vcmp.eq.s32.totalorder %v1374_v57, %v1379_v60  ;;  %vm1390_vm12 = vcmp.eq.s32.totalorder %v1375_v3, %v1379_v60 }
 0x17f   : > { %vm2875_vm8 = vmpackc.low %vm1386_vm6, %vm1384_vm4 }
 0x180   : > { %vm2885_vm13 = vmpackc.low %vm1390_vm12, %vm1388_vm11 }
 0x185   : > { %2053 = vrot.lane.b32.xlu1 %v2052_v47, %s2410_s12 }
 0x194   : > { %2048 = vrot.lane.b32.xlu0 %v2047_v53, %s2410_s12 }
 0x198   : > { %2058 = vrot.lane.b32.xlu0 %v2057_v63, %s2410_s12 }
 0x19c   : > { %2068 = vrot.lane.b32.xlu0 %v2067_v2, %s2410_s12 }
 0x1a0   : > { %2078 = vrot.lane.b32.xlu0 %v2077_v9, %s2410_s12 }
 0x1a9   : > { %933 = vadd.xlane.f32.xlu1 %v870_v55  ;;  %v2858_v55 = vpop.permute.xlu1 %2043 }
 0x1ad   : > { %929 = vadd.xlane.f32.xlu1 %v868_v56  ;;  %v2860_v56 = vpop.permute.xlu0 %2038 }
 0x1be   : > { %2063 = vrot.lane.b32.xlu1 %v2062_v27, %s2410_s12 }
 0x1c2   : > { %2073 = vrot.lane.b32.xlu1 %v2072_v38, %s2410_s12 }
 0x1c6   : > { %2083 = vrot.lane.b32.xlu1 %v2082_v52, %s2410_s12 }
 0x1cb   : > { %v876_v53 = vpop.xlane.xlu0 %875 }
 0x1cc   : > { %v872_v47 = vpop.xlane.xlu1 %871  ;;  %v1743_v0 = vmul.f32 -1.442695, %v876_v53  ;;  %v1383_v53 = vrot.slane %v1370_v34, %v1382_v62 }
 0x1cd   : > { %v1741_v52 = vmul.f32 -1.442695, %v872_v47 }
 0x1ce   : > { %2125 = vpow2.f32 %v1743_v0  ;;  %vm1385_vm2 = vcmp.eq.s32.totalorder %v1372_v48, %v1383_v53  ;;  %vm1387_vm3 = vcmp.eq.s32.totalorder %v1373_v25, %v1383_v53  ;;  %vm1389_vm7 = vcmp.eq.s32.totalorder %v1374_v57, %v1383_v53 }
 0x1cf   : > { %2127 = vpow2.f32 %v1741_v52  ;;  %vm1782_vm5 = vmpackc.low %vm1387_vm3, %vm1385_vm2  ;;  %vm1391_vm9 = vcmp.eq.s32.totalorder %v1375_v3, %v1383_v53 }
 0x1d0   : > { %v878_v63 = vpop.xlane.xlu1 %877  ;;  %1783 = vmatprep.mubr.msk.bf16.mxu1 %vm1782_vm5, %v3124_v30  ;;  %vm2879_vm10 = vmpackc.low %vm1391_vm9, %vm1389_vm7 }
 0x1d1   : > { %v1744_v47 = vmul.f32 -1.442695, %v878_v63 }
 0x1d3   : > { %v884_v2 = vpop.xlane.xlu0 %883  ;;  %2129 = vpow2.f32 %v1744_v47 }
 0x1d4   : > { %v874_v9 = vpop.xlane.xlu1 %873  ;;  %v1747_v63 = vmul.f32 -1.442695, %v884_v2 }
 0x1d5   : > { %v1742_v61 = vmul.f32 -1.442695, %v874_v9 }
 0x1d7   : > { %v880_v27 = vpop.xlane.xlu0 %879  ;;  %2131 = vpow2.f32 %v1742_v61 }
 0x1d8   : > { %v886_v38 = vpop.xlane.xlu1 %885  ;;  %v2126_v49 = vpop.eup %2125  ;;  %v1745_v9 = vmul.f32 -1.442695, %v880_v27  ;;  %2133 = vpow2.f32 %v1747_v63 }
 0x1d9   : > { %v2128_v52 = vpop.eup %2127  ;;  %v1033_v57 = vadd.f32 1.0, %v2126_v49  ;;  %v1748_v3 = vmul.f32 -1.442695, %v886_v38 }
 0x1da   : > { %v1031_v60 = vadd.f32 1.0, %v2128_v52  ;;  %2135 = vpow2.f32 %v1745_v9 }
 0x1db   : > { %v2862_v6 = vpop.xlane.xlu0 %891 }
 0x1dc   : > { %v882_v1 = vpop.xlane.xlu1 %881 }
 0x1dd   : > { %v2130_v20 = vpop.eup %2129  ;;  %v1746_v22 = vmul.f32 -1.442695, %v882_v1 }
 0x1df   : > { %v888_v24 = vpop.xlane.xlu0 %887 }
 0x1e0   : > { %v2870_v59 = vpop.xlane.xlu1 %893  ;;  %v1749_v63 = vmul.f32 -1.442695, %v888_v24 }
 0x1e1   : > { %v2132_v61 = vpop.eup %2131 }
 0x1e2   : > { %v1032_v52 = vadd.f32 1.0, %v2132_v61  ;;  %v2893_v9 = vpop.eup %2133 }
 0x1e3   : > { %v2872_v58 = vpop.xlane.xlu0 %899 }
 0x1e4   : > { %v890_v35 = vpop.xlane.xlu1 %889 }
 0x1e7   : > { %v2883_v34 = vpop.xlane.xlu0 %895 }
 0x1e8   : > { %v2889_v48 = vpop.xlane.xlu1 %901 }
 0x1eb   : > { %v908_v53 = vpop.xlane.xlu0 %907 }
 0x1ec   : > { %v1759_v30 = vmul.f32 -1.442695, %v908_v53  ;;  %v2891_v36 = vpop.xlane.xlu1 %897  ;;  %v1034_v53 = vadd.f32 1.0, %v2130_v20 }
 0x1ee   : > { %2137 = vpow2.f32 %v1759_v30 }
 0x1ef   : > { %v904_v47 = vpop.xlane.xlu0 %903  ;;  %2139 = vrcp.f32 %v1033_v57  ;;  %v2136_v57 = vpop.eup %2135 }
 0x1f0   : > { %v1757_v31 = vmul.f32 -1.442695, %v904_v47  ;;  %v910_v32 = vpop.xlane.xlu1 %909  ;;  %2141 = vrcp.f32 %v1031_v60 }
 0x1f1   : > { %v1760_v2 = vmul.f32 -1.442695, %v910_v32  ;;  %2143 = vpow2.f32 %v1748_v3  ;;  %v1750_v32 = vmul.f32 -1.442695, %v890_v35 }
 0x1f2   : > { %2145 = vpow2.f32 %v1757_v31 }
 0x1f3   : > { %v906_v27 = vpop.xlane.xlu0 %905  ;;  %2147 = vpow2.f32 %v1746_v22 }
 0x1f4   : > { %v1758_v28 = vmul.f32 -1.442695, %v906_v27  ;;  %2149 = vpow2.f32 %v1760_v2 }
 0x1f5   : > { %v918_v49 = vpop.xlane.xlu1 %917 }
 0x1f6   : > { %v1764_v38 = vmul.f32 -1.442695, %v918_v49  ;;  %2151 = vpow2.f32 %v1758_v28 }
 0x1f7   : > { %v916_v30 = vpop.xlane.xlu0 %915  ;;  %2153 = vrcp.f32 %v1034_v53 }
 0x1f8   : > { %v1763_v1 = vmul.f32 -1.442695, %v916_v30  ;;  %2155 = vpow2.f32 %v1764_v38  ;;  %v2138_v3 = vpop.eup %2137  ;;  %v1035_v30 = vadd.f32 1.0, %v2136_v57 }
 0x1f9   : > { %v914_v60 = vpop.xlane.xlu1 %913  ;;  %2157 = vpow2.f32 %v1749_v63  ;;  %v2895_v20 = vpop.eup %2139  ;;  %v1049_v22 = vadd.f32 1.0, %v2138_v3 }
 0x1fa   : > { %2159 = vrcp.f32 %v1032_v52  ;;  %v1762_v31 = vmul.f32 -1.442695, %v914_v60  ;;  %v2897_v47 = vpop.eup %2141 }
 0x1fb   : > { %v912_v24 = vpop.xlane.xlu0 %911  ;;  %2161 = vpow2.f32 %v1763_v1  ;;  %v2144_v2 = vpop.eup %2143 }
 0x1fc   : > { %v1761_v28 = vmul.f32 -1.442695, %v912_v24  ;;  %2163 = vpow2.f32 %v1750_v32  ;;  %v2146_v61 = vpop.eup %2145 }
 0x1fd   : > { %v926_v27 = vpop.xlane.xlu1 %925  ;;  %2165 = vrcp.f32 %v1049_v22  ;;  %v2148_v53 = vpop.eup %2147  ;;  %v1047_v49 = vadd.f32 1.0, %v2146_v61 }
 0x1fe   : > { %v1768_v35 = vmul.f32 -1.442695, %v926_v27  ;;  %2167 = vpow2.f32 %v1762_v31  ;;  %v2150_v38 = vpop.eup %2149 }
 0x1ff   : > { %v924_v63 = vpop.xlane.xlu0 %923  ;;  %2169 = vpow2.f32 %v1761_v28  ;;  %v1050_v60 = vadd.f32 1.0, %v2150_v38  ;;  %v1036_v28 = vadd.f32 1.0, %v2148_v53  ;;  %v2253_v38 = vadd.high.f32.bf16 %v1128_v7, %v2825_v13 }
 0x200   : > { %v2152_v52 = vpop.eup %2151  ;;  %2171 = vrcp.f32 %v1047_v49  ;;  %v1767_v32 = vmul.f32 -1.442695, %v924_v63  ;;  %v2255_v53 = vadd.high.f32.bf16 %v1146_v15, %v2827_v21  ;;  %v2257_v7 = vadd.high.f32.bf16 %v1130_v17, %v2837_v37 }
 0x201   : > { %v922_v3 = vpop.xlane.xlu1 %921  ;;  %v2899_v29 = vpop.eup %2153  ;;  %v1048_v1 = vadd.f32 1.0, %v2152_v52  ;;  %2173 = vpow2.f32 %v1768_v35  ;;  %v3148_v17 = vunpack.c.h.bf16 %v2592_v11 }
 0x202   : > { %v2156_v24 = vpop.eup %2155  ;;  %2175 = vrcp.f32 %v1050_v60  ;;  %v1766_v22 = vmul.f32 -1.442695, %v922_v3  ;;  %v2254_v60 = vadd.low.f32.bf16 %v1127_v5, %v2825_v13  ;;  %v2256_v3 = vadd.low.f32.bf16 %v1145_v12, %v2827_v21 }
 0x203   : > { %v920_v27 = vpop.xlane.xlu0 %919  ;;  %v2158_v18 = vpop.eup %2157  ;;  %2177 = vrcp.f32 %v1048_v1  ;;  %v1054_v57 = vadd.f32 1.0, %v2156_v24  ;;  %v1038_v5 = vadd.f32 1.0, %v2144_v2  ;;  %v1037_v1 = vadd.f32 1.0, %v2893_v9 }
 0x204   : > { %v1765_v31 = vmul.f32 -1.442695, %v920_v27  ;;  %v2160_v61 = vpop.eup %2159  ;;  %2179 = vrcp.f32 %v1035_v30  ;;  %v2259_v21 = vadd.high.f32.bf16 %v3148_v17, %v2846_v50  ;;  %v1039_v24 = vadd.f32 1.0, %v2158_v18 }
 0x205   : > { %v2162_v19 = vpop.eup %2161  ;;  %2181 = vpow2.f32 %v1767_v32  ;;  %v1320_v27 = vmul.f32 %v2253_v38, %v2160_v61  ;;  %v1319_v18 = vmul.f32 %v2254_v60, %v2897_v47  ;;  %v1322_v61 = vmul.f32 %v2257_v7, %v2899_v29 }
 0x206   : > { %v2164_v49 = vpop.eup %2163  ;;  %v1053_v35 = vadd.f32 1.0, %v2162_v19  ;;  %2183 = vpow2.f32 %v1766_v22  ;;  %v3151_v17 = vunpack.c.l.bf16 %v2614_v23  ;;  %v3152_v7 = vunpack.c.h.bf16 %v2599_v14 }
 0x207   : > { %v2904_v63 = vpop.xlane.xlu0 %931  ;;  %v2166_v52 = vpop.eup %2165  ;;  %2185 = vpow2.f32 %v1765_v31  ;;  %v1040_v37 = vadd.f32 1.0, %v2164_v49 }
 0x208   : > { %v2168_v30 = vpop.eup %2167  ;;  %2187 = vrcp.f32 %v1036_v28  ;;  %v1337_v49 = vmul.f32 %v2256_v3, %v2166_v52  ;;  %v2262_v52 = vadd.low.f32.bf16 %v3151_v17, %v2848_v51  ;;  %v2054_v3 = vpop.permute.xlu1 %2053  ;;  %v3161_v17 = vunpack.c.l.bf16 %v2695_v43 }
 0x209   : > { %v2170_v19 = vpop.eup %2169  ;;  %2189 = vrcp.f32 %v1054_v57  ;;  %v1052_v13 = vadd.f32 1.0, %v2168_v30 }
 0x20a   : > { %v2172_v15 = vpop.eup %2171  ;;  %2191 = vrcp.f32 %v1053_v35  ;;  %v1051_v32 = vadd.f32 1.0, %v2170_v19 }
 0x20b   : > { %v2922_v8 = vpop.xlane.xlu0 %927  ;;  %v2174_v12 = vpop.eup %2173  ;;  %2193 = vrcp.f32 %v1052_v13  ;;  %v1335_v28 = vmul.f32 %v2260_v16, %v2172_v15 }
 0x20c   : > { %v2176_v22 = vpop.eup %2175  ;;  %2195 = vrcp.f32 %v1051_v32  ;;  %v1058_v9 = vadd.f32 1.0, %v2174_v12  ;;  %v1351_v12 = vpack.c.bf16 %v1320_v27, %v1319_v18 }
 0x20d   : > { %v2178_v2 = vpop.eup %2177  ;;  %2197 = vrcp.f32 %v1038_v5  ;;  %v1338_v35 = vmul.f32 %v2255_v53, %v2176_v22  ;;  %v3150_v53 = vunpack.c.h.bf16 %v2614_v23  ;;  %v3153_v22 = vunpack.c.l.bf16 %v2599_v14 }
 0x20e   : > { %v2180_v31 = vpop.eup %2179  ;;  %2199 = vrcp.f32 %v1037_v1  ;;  %v1336_v57 = vmul.f32 %v2259_v21, %v2178_v2  ;;  %v1321_v21 = vmul.f32 %v2258_v4, %v2895_v20  ;;  %v3154_v23 = vunpack.c.h.bf16 %v2624_v26 }
 0x20f   : > { %v2182_v30 = vpop.eup %2181  ;;  %2201 = vrcp.f32 %v1039_v24  ;;  %v2049_v11 = vpop.permute.xlu0 %2048  ;;  %v2261_v15 = vadd.high.f32.bf16 %v3150_v53, %v2848_v51  ;;  %v1360_v47 = vpack.c.bf16 %v1338_v35, %v1337_v49  ;;  %v2263_v24 = vadd.high.f32.bf16 %v3152_v7, %v2855_v54 }
 0x210   : > { %v2184_v19 = vpop.eup %2183  ;;  %2203 = vrcp.f32 %v1040_v37  ;;  %v1057_v13 = vadd.f32 1.0, %v2182_v30  ;;  %v1359_v50 = vpack.c.bf16 %v1336_v57, %v1335_v28  ;;  %v2264_v10 = vadd.low.f32.bf16 %v3153_v22, %v2855_v54 }
 0x211   : > { %v2186_v32 = vpop.eup %2185  ;;  %2205 = vrcp.f32 %v1058_v9  ;;  %v1056_v5 = vadd.f32 1.0, %v2184_v19  ;;  %v2265_v51 = vadd.high.f32.bf16 %v3154_v23, %v2860_v56  ;;  %v3155_v37 = vunpack.c.l.bf16 %v2624_v26 }
 0x212   : > { %v2188_v38 = vpop.eup %2187  ;;  %2207 = vrcp.f32 %v1057_v13  ;;  %v1055_v1 = vadd.f32 1.0, %v2186_v32  ;;  %1823 = vmatprep.subr.bf16.mxu1 %v1359_v50  ;;  %v1352_v4 = vpack.c.bf16 %v1322_v61, %v1321_v21  ;;  %v3156_v30 = vunpack.c.h.bf16 %v2641_v33 }
 0x213   : > { %v2190_v60 = vpop.eup %2189  ;;  %2209 = vrcp.f32 %v1056_v5  ;;  %1824 = vmatpush3.bf16.msra.mxu1 %v1351_v12  ;;  %v2266_v20 = vadd.low.f32.bf16 %v3155_v37, %v2860_v56  ;;  %v1324_v2 = vmul.f32 %v2261_v15, %v2188_v38  ;;  %v2059_v27 = vpop.permute.xlu0 %2058  ;;  %v1323_v19 = vmul.f32 %v2262_v52, %v2180_v31 }
 0x214   : > { %v2192_v29 = vpop.eup %2191  ;;  %2211 = vrcp.f32 %v1055_v1  ;;  %1825 = vmatprep.subr.bf16.mxu1 %v1360_v47  ;;  %v2267_v18 = vadd.high.f32.bf16 %v3156_v30, %v2858_v55  ;;  %v3157_v26 = vunpack.c.l.bf16 %v2641_v33  ;;  %v1342_v49 = vmul.f32 %v2265_v51, %v2190_v60 }
 0x215   : > { %v2194_v16 = vpop.eup %2193  ;;  %v1341_v54 = vmul.f32 %v2266_v20, %v2192_v29  ;;  %v3158_v5 = vunpack.c.h.bf16 %v2666_v39  ;;  %v3159_v61 = vunpack.c.l.bf16 %v2666_v39  ;;  %v1353_v53 = vpack.c.bf16 %v1324_v2, %v1323_v19 }
 0x216   : > { %v2196_v9 = vpop.eup %2195  ;;  %v1340_v14 = vmul.f32 %v2263_v24, %v2194_v16  ;;  %v2268_v56 = vadd.low.f32.bf16 %v3157_v26, %v2858_v55  ;;  %v3160_v47 = vunpack.c.h.bf16 %v2695_v43  ;;  %v2272_v52 = vadd.low.f32.bf16 %v3161_v17, %v2049_v11 }
 0x217   : > { %v2198_v28 = vpop.eup %2197  ;;  %1826 = vmatpush3.bf16.msra.mxu1 %v1352_v4  ;;  %v1339_v57 = vmul.f32 %v2264_v10, %v2196_v9  ;;  %v2269_v12 = vadd.high.f32.bf16 %v3158_v5, %v2054_v3  ;;  %v2270_v38 = vadd.low.f32.bf16 %v3159_v61, %v2054_v3  ;;  %v3162_v33 = vunpack.c.l.bf16 %v2702_v44 }
 0x218   : > { %v2200_v35 = vpop.eup %2199  ;;  %v1326_v15 = vmul.f32 %v2267_v18, %v2198_v28  ;;  %v2271_v31 = vadd.high.f32.bf16 %v3160_v47, %v2049_v11  ;;  %v1362_v60 = vpack.c.bf16 %v1342_v49, %v1341_v54  ;;  %v3163_v39 = vunpack.c.h.bf16 %v2702_v44 }
 0x219   : > { %v2202_v13 = vpop.eup %2201  ;;  %v1361_v50 = vpack.c.bf16 %v1340_v14, %v1339_v57  ;;  %v2273_v55 = vadd.low.f32.bf16 %v3162_v33, %v2059_v27  ;;  %v1325_v29 = vmul.f32 %v2268_v56, %v2200_v35  ;;  %v1751_v51 = vmul.f32 -1.442695, %v2862_v6 }
 0x21a   : > { %v2204_v32 = vpop.eup %2203  ;;  %v2274_v3 = vadd.high.f32.bf16 %v3163_v39, %v2059_v27  ;;  %v1327_v10 = vmul.f32 %v2270_v38, %v2202_v13  ;;  %v1752_v37 = vmul.f32 -1.442695, %v2870_v59  ;;  %v1753_v44 = vmul.f32 -1.442695, %v2883_v34 }
 0x21b   : > { %v2206_v1 = vpop.eup %2205  ;;  %1827 = vmatprep.subr.bf16.mxu1 %v1361_v50  ;;  %v1328_v22 = vmul.f32 %v2269_v12, %v2204_v32  ;;  %v1354_v16 = vpack.c.bf16 %v1326_v15, %v1325_v29  ;;  %2213 = vpow2.f32 %v1751_v51  ;;  %v1754_v27 = vmul.f32 -1.442695, %v2891_v36 }
 0x21c   : > { %v2208_v21 = vpop.eup %2207  ;;  %1828 = vmatpush3.bf16.msra.mxu1 %v1353_v53  ;;  %v1346_v20 = vmul.f32 %v2274_v3, %v2206_v1  ;;  %2215 = vpow2.f32 %v1752_v37  ;;  %v1755_v28 = vmul.f32 -1.442695, %v2872_v58  ;;  %v1756_v6 = vmul.f32 -1.442695, %v2889_v48 }
 0x21d   : > { %v2210_v7 = vpop.eup %2209  ;;  %1829 = vmatprep.subr.bf16.mxu1 %v1362_v60  ;;  %v1345_v11 = vmul.f32 %v2273_v55, %v2208_v21  ;;  %v1355_v2 = vpack.c.bf16 %v1328_v22, %v1327_v10  ;;  %2217 = vpow2.f32 %v1753_v44  ;;  %v1769_v14 = vmul.f32 -1.442695, %v2922_v8 }
 0x21e   : > { %v2212_v24 = vpop.eup %2211  ;;  %v1344_v43 = vmul.f32 %v2271_v31, %v2210_v7  ;;  %2219 = vpow2.f32 %v1754_v27  ;;  %v1771_v34 = vmul.f32 -1.442695, %v2904_v63  ;;  %v3164_v61 = vunpack.c.h.bf16 %v2674_v40 }
 0x21f   : > { %v1343_v23 = vmul.f32 %v2272_v52, %v2212_v24  ;;  %v1364_v9 = vpack.c.bf16 %v1346_v20, %v1345_v11  ;;  %2221 = vpow2.f32 %v1755_v28  ;;  %v3165_v53 = vunpack.c.l.bf16 %v2674_v40  ;;  %v2069_v40 = vpop.permute.xlu0 %2068 }
 0x220   : > { %1830 = vmatpush3.bf16.msra.mxu1 %v1354_v16  ;;  %2223 = vpow2.f32 %v1756_v6  ;;  %v3166_v29 = vunpack.c.h.bf16 %v2677_v41  ;;  %v3167_v39 = vunpack.c.l.bf16 %v2677_v41  ;;  %v3168_v37 = vunpack.c.h.bf16 %v2684_v42 }
 0x221   : > { %v1363_v4 = vpack.c.bf16 %v1344_v43, %v1343_v23  ;;  %2225 = vpow2.f32 %v1769_v14 }
 0x223   : > { %1831 = vmatprep.subr.bf16.mxu1 %v1363_v4  ;;  %v3169_v4 = vunpack.c.l.bf16 %v2684_v42  ;;  %v2079_v28 = vpop.permute.xlu0 %2078 }
 0x224   : > { %1832 = vmatpush3.bf16.msra.mxu1 %v1355_v2 }
 0x225   : > { %1833 = vmatprep.subr.bf16.mxu1 %v1364_v9  ;;  %v2214_v59 = vpop.eup %2213 }
 0x226   : > { %v2216_v57 = vpop.eup %2215  ;;  %v1041_v54 = vadd.f32 1.0, %v2214_v59 }
 0x227   : > { %v1042_v35 = vadd.f32 1.0, %v2216_v57  ;;  %v2218_v30 = vpop.eup %2217  ;;  %v3170_v57 = vunpack.c.h.bf16 %v2705_v45 }
 0x228   : > { %v2220_v18 = vpop.eup %2219  ;;  %2227 = vrcp.f32 %v1041_v54  ;;  %v1043_v58 = vadd.f32 1.0, %v2218_v30  ;;  %v3171_v54 = vunpack.c.l.bf16 %v2705_v45  ;;  %v3172_v30 = vunpack.c.h.bf16 %v2712_v46 }
 0x229   : > { %2229 = vrcp.f32 %v1042_v35  ;;  %v2222_v48 = vpop.eup %2221  ;;  %v1044_v13 = vadd.f32 1.0, %v2220_v18  ;;  %v2281_v14 = vadd.high.f32.bf16 %v3170_v57, %v2069_v40  ;;  %v3174_v45 = vmov 1.0|1.0  }
 0x22a   : > { %2231 = vpow2.f32 %v1771_v34  ;;  %v2224_v26 = vpop.eup %2223  ;;  %v1045_v50 = vadd.f32 1.0, %v2222_v48  ;;  %v2282_v35 = vadd.low.f32.bf16 %v3171_v54, %v2069_v40  ;;  %v2283_v34 = vadd.high.f32.bf16 %v3172_v30, %v2079_v28 }
 0x22b   : > { %v1046_v49 = vadd.f32 1.0, %v2224_v26  ;;  %v2226_v32 = vpop.eup %2225 }
 0x22c   : > { %v1059_v47 = vadd.f32 1.0, %v2226_v32 }
 0x232   : > { %v2228_v5 = vpop.eup %2227 }
 0x233   : > { %v2230_v12 = vpop.eup %2229 }
 0x234   : > { %v2232_v1 = vpop.eup %2231 }
 0x235   : > { %v1061_v21 = vadd.f32 1.0, %v2232_v1 }
 0x236   : > { %v934_v36 = vpop.xlane.xlu1 %933 }
 0x237   : > { %v1772_v19 = vmul.f32 -1.442695, %v934_v36  ;;  %v3173_v36 = vunpack.c.l.bf16 %v2712_v46 }
 0x239   : > { %2233 = vpow2.f32 %v1772_v19 }
 0x23a   : > { %v930_v56 = vpop.xlane.xlu1 %929  ;;  %2235 = vrcp.f32 %v1043_v58  ;;  %v2284_v58 = vadd.low.f32.bf16 %v3173_v36, %v2079_v28 }
 0x23b   : > { %v1770_v8 = vmul.f32 -1.442695, %v930_v56  ;;  %2237 = vrcp.f32 %v1044_v13 }
 0x23d   : > { %2239 = vpow2.f32 %v1770_v8 }
 0x23e   : > { %v2064_v63 = vpop.permute.xlu1 %2063  ;;  %2241 = vrcp.f32 %v1045_v50 }
 0x23f   : > { %2243 = vrcp.f32 %v1046_v49  ;;  %v2275_v38 = vadd.high.f32.bf16 %v3164_v61, %v2064_v63  ;;  %v2276_v15 = vadd.low.f32.bf16 %v3165_v53, %v2064_v63  ;;  %v1412_v49 = vld [vmem:[#allocation2] sm:$0xff] }
 0x240   : > { %2245 = vrcp.f32 %v1059_v47 }
 0x241   : > { %v1330_v52 = vmul.f32 %v2275_v38, %v2230_v12  ;;  %v1329_v33 = vmul.f32 %v2276_v15, %v2228_v5  ;;  %v1413_v12 = vld [vmem:[#allocation2 + $0x8] sm:$0xff]  ;;  %v1414_v15 = vld [vmem:[#allocation2 + $0x10] sm:$0xff] }
 0x242   : > { %v2074_v31 = vpop.permute.xlu1 %2073 }
 0x243   : > { %v2234_v17 = vpop.eup %2233  ;;  %v2277_v7 = vadd.high.f32.bf16 %v3166_v29, %v2074_v31  ;;  %v2278_v3 = vadd.low.f32.bf16 %v3167_v39, %v2074_v31  ;;  %v1356_v24 = vpack.c.bf16 %v1330_v52, %v1329_v33  ;;  %v1415_v31 = vld [vmem:[#allocation2 + $0x18] sm:$0xff] }
 0x244   : > { %v1062_v55 = vadd.f32 1.0, %v2234_v17  ;;  %v2236_v60 = vpop.eup %2235 }
 0x245   : > { %v2238_v22 = vpop.eup %2237  ;;  %v1331_v43 = vmul.f32 %v2278_v3, %v2236_v60  ;;  %1834 = vmatpush3.bf16.msra.mxu1 %v1356_v24 }
 0x246   : > { %v2084_v10 = vpop.permute.xlu1 %2083  ;;  %v1332_v23 = vmul.f32 %v2277_v7, %v2238_v22  ;;  %2247 = vrcp.f32 %v1062_v55 }
 0x247   : > { %v2240_v16 = vpop.eup %2239  ;;  %2249 = vrcp.f32 %v1061_v21  ;;  %v2279_v20 = vadd.high.f32.bf16 %v3168_v37, %v2084_v10  ;;  %v2280_v41 = vadd.low.f32.bf16 %v3169_v4, %v2084_v10 }
 0x248   : > { %v1060_v11 = vadd.f32 1.0, %v2240_v16  ;;  %v2242_v51 = vpop.eup %2241  ;;  %v1357_v2 = vpack.c.bf16 %v1332_v23, %v1331_v43 }
 0x249   : > { %v2244_v9 = vpop.eup %2243  ;;  %v1333_v27 = vmul.f32 %v2280_v41, %v2242_v51 }
 0x24a   : > { %2251 = vrcp.f32 %v1060_v11  ;;  %v1334_v44 = vmul.f32 %v2279_v20, %v2244_v9  ;;  %v2246_v59 = vpop.eup %2245 }
 0x24b   : > { %v1347_v48 = vmul.f32 %v2282_v35, %v2246_v59 }
 0x24c   : > { %v1358_v6 = vpack.c.bf16 %v1334_v44, %v1333_v27 }
 0x250   : > { %v2248_v18 = vpop.eup %2247 }
 0x251   : > { %v2250_v42 = vpop.eup %2249  ;;  %v1350_v26 = vmul.f32 %v2283_v34, %v2248_v18 }
 0x252   : > { %v1349_v56 = vmul.f32 %v2284_v58, %v2250_v42 }
 0x254   : > { %v2252_v19 = vpop.eup %2251  ;;  %v1366_v8 = vpack.c.bf16 %v1350_v26, %v1349_v56 }
 0x255   : > { %v1348_v13 = vmul.f32 %v2281_v14, %v2252_v19 }
 0x257   : > { %v1365_v50 = vpack.c.bf16 %v1348_v13, %v1347_v48 }
 0x259   : > { %1835 = vmatprep.subr.bf16.mxu1 %v1365_v50 }
 0x25a   : > { %1836 = vmatpush3.bf16.msra.mxu1 %v1357_v2 }
 0x25b   : > { %1837 = vmatprep.subr.bf16.mxu1 %v1366_v8 }
 0x25e   : > { %1838 = vmatpush3.bf16.msra.mxu1 %v1358_v6 }
 0x261   : > { %1785 = vmatmul.mubr.msk.bf16.vlgmr.msra.gmra.mrb[0].mxu1 %vm2875_vm8, %v3174_v45 }
 0x262   : > { %1787 = vmatprep.mubr.msk.bf16.mxu1 %vm2879_vm10, %v3174_v45 }
 0x269   : > { %1789 = vmatmul.mubr.msk.bf16.gmra.mrb[4].mxu1 %vm2885_vm13, %v3174_v45 }
 0x334   : > { %v1839_v46 = vpop.f32.mrb[0].mxu1 }
 0x335   : > { %v1840_v63 = vpop.f32.mrb[1].mxu1 }
 0x336   : > { %v1841_v32 = vadd.f32 %v1840_v63, %v1839_v46  ;;  %v1842_v5 = vpop.f32.mrb[2].mxu1 }
 0x337   : > { %v1843_v61 = vpop.f32.mrb[3].mxu1 }
 0x338   : > { %v1465_v38 = vadd.f32 %v1841_v32, %v1412_v49  ;;  %v1844_v53 = vadd.f32 %v1843_v61, %v1842_v5 }
 0x33a   : > { %1470 = vst.msk [vmem:[#allocation2] sm:$0xff] %vm1469_vm14, %v1465_v38  ;;  %v1466_v0 = vadd.f32 %v1844_v53, %v1413_v12 }
 0x33c   : > { %1471 = vst.msk [vmem:[#allocation2 + $0x8] sm:$0xff] %vm1469_vm14, %v1466_v0  ;;  %v1845_v62 = vpop.f32.mrb[4].mxu1 }
 0x33d   : > { %v1846_v1 = vpop.f32.mrb[5].mxu1 }
 0x33e   : > { %v1847_v25 = vadd.f32 %v1846_v1, %v1845_v62  ;;  %v1848_v47 = vpop.f32.mrb[6].mxu1 }
 0x33f   : > { %v1849_v17 = vpop.f32.mrb[7].mxu1 }
 0x340   : > { %v1467_v52 = vadd.f32 %v1847_v25, %v1414_v15  ;;  %v1850_v33 = vadd.f32 %v1849_v17, %v1848_v47 }
 0x342   : > { %1472 = vst.msk [vmem:[#allocation2 + $0x10] sm:$0xff] %vm1469_vm14, %v1467_v52  ;;  %v1468_v55 = vadd.f32 %v1850_v33, %v1415_v31 }
 0x344   : > { %1473 = vst.msk [vmem:[#allocation2 + $0x18] sm:$0xff] %vm1469_vm14, %v1468_v55 }
 0x345 PF: > { %p1790_p3 = scmp.ne.s32.totalorder %s2389_s16, 1 }
 0x346   : > { %v1482_v60 = vld [vmem:[%s3100_s7] sm:$0xff] (!%p1790_p3)  ;;  %v1483_v21 = vld [vmem:[%s3100_s7 + $0x8] sm:$0xff] (!%p1790_p3)  ;;  %v1484_v29 = vld [vmem:[%s3100_s7 + $0x10] sm:$0xff] (!%p1790_p3)  ;;  %vm1486_vm15 = vcmask (!%p1790_p3), 261120  }
 0x347   : > { %1477 = sbr.rel (%p1790_p3) target bundleno = 1064 (0x428), region = 56  ;;  %v1917_v7 = vpack.c.bf16 (!%p1790_p3), %v1483_v21, %v1482_v60  ;;  %v1485_v39 = vld [vmem:[%s3100_s7 + $0x18] sm:$0xff] (!%p1790_p3)  ;;  %v1478_v3 = vld [vmem:[#allocation2] sm:$0xff] (!%p1790_p3)  ;;  %v1479_v40 = vld [vmem:[#allocation2 + $0x8] sm:$0xff] (!%p1790_p3) }
 0x348   : > { %v1921_v22 = vpack.c.bf16 (!%p1790_p3), %v1485_v39, %v1484_v29  ;;  %1911 = vmatprep.mubr.msk.f32.mxu0 (!%p1790_p3), %vm1486_vm15, %v1478_v3 }
 0x349   : > { %v1480_v24 = vld [vmem:[#allocation2 + $0x10] sm:$0xff] (!%p1790_p3)  ;;  %1918 = vmatprep.subr.bf16.mxu0 (!%p1790_p3), %v1917_v7  ;;  %1925 = vmatprep.subr.bf16.mxu1 (!%p1790_p3), %v1917_v7 }
 0x34a   : > { %1914 = vmatprep.mubr.msk.f32.mxu1 (!%p1790_p3), %vm1486_vm15, %v1480_v24  ;;  %1920 = vmatpush3.bf16.msra.mxu0 (!%p1790_p3), %v1917_v7 }
 0x34b   : > { %1927 = vmatpush3.bf16.msra.mxu1 (!%p1790_p3), %v1917_v7  ;;  %1922 = vmatprep.subr.bf16.mxu0 (!%p1790_p3), %v1921_v22  ;;  %v1481_v10 = vld [vmem:[#allocation2 + $0x18] sm:$0xff] (!%p1790_p3) }
 0x34c   : > { %1926 = vmatprep.subr.bf16.mxu1 (!%p1790_p3), %v1921_v22 }
 0x34e   : > { %1924 = vmatpush3.bf16.msra.mxu0 %v1921_v22 }
 0x34f   : > { %1928 = vmatpush3.bf16.msra.mxu1 %v1921_v22 }
 0x351   : > { %1912 = vmatmul.mubr.msk.f32.vlgmr.msra.gmra.mrb[0].mxu0 %vm1486_vm15, %v1479_v40 }
 0x352   : > { %1915 = vmatmul.mubr.msk.f32.vlgmr.msra.gmra.mrb[0].mxu1 %vm1486_vm15, %v1481_v10 }
 0x424   : > { %v1913_v16 = vpop.f32.mrb[0].mxu0 }
 0x425   : > { %v1916_v23 = vpop.f32.mrb[0].mxu1  ;;  %1585 = vst [vmem:[%s2557_s22 + $0x8] sm:$0xff] %v1913_v16  ;;  %v1565_v43 = vpop.f32.mrb[1].mxu0 }
 0x426   : > { %1587 = vst [vmem:[%s2557_s22 + $0x18] sm:$0xff] %v1916_v23  ;;  %v1575_v11 = vpop.f32.mrb[1].mxu1  ;;  %1584 = vst [vmem:[%s2557_s22] sm:$0xff] %v1565_v43 }
 0x427   : > { %1586 = vst [vmem:[%s2557_s22 + $0x10] sm:$0xff] %v1575_v11 }
 0x428 PF: > { %s1800_s16 = sshll.u32 %s2393_s17, 9  ;;  %s1602_s0 = sshll.u32 %s2557_s22, 4  ;;  %s3038_s0 = int_to_ptr.vmem [resolvable:$true] %s1602_s0 }
 0x429   : > { %s3035_s9 = scalar_lea.hbm %s3101_s8, %s1800_s16  ;;  %s3175_s29 = sand.u32 1, %s2381_s14  }
 0x42a   : > { %s3042_s21 = scalar_lea.sflag [#allocation7], %s3175_s29  ;;  %s2309_s27 = scalar_lea.vmem %s3038_s0, 512 }
 0x42b   : > { %p2310_p4 = scmp.ne.s32.totalorder %s3038_s0, %s2309_s27  ;;  %s2412_s17 = smov [#allocation6]  }
 0x42c   : > { %s2313_s19 = sshll.u32 %s2412_s17, 4  ;;  %s2314_s19 = int_to_ptr.vmem [resolvable:$false] %s2313_s19 }
 0x42d   : > { %p2311_p6 = pnand %p2310_p4, %p2515_p13  ;;  %s2315_s13 = scalar_lea.vmem %s2314_s19, 1024 }
 0x42e   : > { %p2316_p8 = scmp.lt.s32.totalorder %s3038_s0, %s2314_s19  ;;  %p2317_p9 = scmp.lt.s32.totalorder %s2315_s13, %s2309_s27 }
 0x42f   : > { %p2312_p7 = pneg %p2311_p6 }
 0x430   : > { %p2318_p10 = por %p2317_p9, %p2316_p8 }
 0x432   : > { %p2319_p11 = pnand %p2318_p10, %p2312_p7 }
 0x434   : > { %2322 = shalt.err (!%p2319_p11)
}
 0x435   : > { %s2323_s22 = scalar_lea.hbm %s3035_s9, 512  ;;  %s2327_s11 = scalar_lea.hbm %s3101_s8, 2048 }
 0x436   : > { %p2324_p12 = scmp.ne.s32.totalorder %s3035_s9, %s2323_s22  ;;  %p2328_p2 = scmp.lt.u32.totalorder %s3035_s9, %s3101_s8 }
 0x437   : > { %p2329_p3 = scmp.lt.u32.totalorder %s2327_s11, %s2323_s22  ;;  %p2331_p6 = scmp.lt.u32.totalorder %s2323_s22, %s3035_s9 }
 0x438   : > { %p2325_p0 = pnand %p2324_p12, %p2515_p13 }
 0x439   : > { %p2330_p4 = por %p2329_p3, %p2328_p2 }
 0x43a   : > { %p2326_p1 = pneg %p2325_p0 }
 0x43b   : > { %p2332_p7 = por %p2331_p6, %p2330_p4 }
 0x43d   : > { %p2333_p8 = pnand %p2332_p7, %p2326_p1 }
 0x43f   : > { %2336 = shalt.err (!%p2333_p8)
}
 0x440   : > { %s2413_s23 = smov 128   ;;  %s2414_s16 = smov 8  }
 0x441   : > { %1929 = dma.vmem_to_hbm [thread:$0]  (%p2515_p13), %s3038_s0, 512, %s3035_s9, %s3042_s21, %s2413_s23, %s2413_s23, %s2414_s16  }
 0x442 PF: > { %p1935_p9 = scmp.ge.s32.totalorder %s2405_s20, 2  ;;  %s1617_s24 = sand.u32 1, %s2377_s1  }
 0x443   : > { %s1618_s30 = scalar_lea.sflag [#allocation7], %s1617_s24 }
 0x444   : > { %p1932_p10 = pnand %p1935_p9, %p2525_p5 }
 0x446   : > { %2372 = dma.done.wait (!%p1932_p10), %s1618_s30, 512  }
 0x447   : > { %2374 = vsyncadd (!%p1932_p10), %s1618_s30, 4294966784  ;;  %s31_s20 = sadd.s32 1, %s2405_s20   ;;  %s3176_s29 = sld [smem:[#allocation14_spill]] }
 0x448   : > { %p28_p11 = scmp.ge.s32.totalorder %s31_s20, 10   ;;  %s3177_s16 = sld [smem:[#allocation10_spill]] }
 0x449   : > { %s3178_s17 = sld [smem:[#allocation11_spill]]  ;;  %s3179_s18 = sld [smem:[#allocation12_spill]] }
 0x44a   : > { %s3180_s19 = sld [smem:[#allocation13_spill]]  ;;  %s3181_s1 = smov %s2381_s14 }
 0x44b   : > { %s3182_s14 = smov %s2385_s15  ;;  %30 = sbr.rel (!%p28_p11) target bundleno = 30 (0x1e), region = 94 }
 0x44d   : > { %s3183_s15 = smov %s3176_s29 }
 0x452   :  { %1623 = vsyncpa [#allocation7], 1 }
 0x453   :  { %1625 = vsyncpa [#allocation7 + $0x1], 1 }

</bundles_post_ra>
